<compile_context>
chip_gen: v7x
topology: tpu7x:2x2x1
jax: 0.10.0
libtpu: 0.0.40
codegen_flags: <defaults>
</compile_context>

<pallas_src>
import jax
import jax.numpy as jnp
from jax.experimental import pallas as pl
from jax.experimental.pallas import tpu as pltpu


def _round_up(x, m):
    return (x + m - 1) // m * m


# ---------------------------------------------------------------------------
# Pallas kernel: one matmul (+ bias) per layer, M-tiled.
# ---------------------------------------------------------------------------
def _matmul_bias_kernel(x_ref, w_ref, b_ref, o_ref):
    """x_ref: (tm, Kc) bf16 im2col tile, w_ref: (Kc, Cout) bf16, b_ref: (1, Cout) f32,
       o_ref: (tm, Cout) f32."""
    o_ref[...] = (
        jnp.dot(x_ref[...], w_ref[...], preferred_element_type=jnp.float32)
        + b_ref[...]
    )


def _matmul_bias(slab, w, b, *, tm_cap=1024):
    """(M, Kc) @ (Kc, Cout) + b -> (M, Cout) f32.  bf16 operands, f32 accumulation."""
    M, Kc = slab.shape
    Cout = w.shape[1]
    # Row tile: multiple of 8 (sublane), capped so 2x-buffered tiles fit v7x's 64 MiB VMEM.
    tm = min(_round_up(M, 8), tm_cap)
    Mp = _round_up(M, tm)
    if Mp != M:
        slab = jnp.pad(slab, ((0, Mp - M), (0, 0)))
    slab = slab.astype(jnp.bfloat16)
    w = w.astype(jnp.bfloat16)
    b = b.reshape(1, Cout).astype(jnp.float32)

    out = pl.pallas_call(
        _matmul_bias_kernel,
        out_shape=jax.ShapeDtypeStruct((Mp, Cout), jnp.float32),
        grid=(Mp // tm,),
        in_specs=[
            pl.BlockSpec((tm, Kc), lambda i: (i, 0)),
            pl.BlockSpec((Kc, Cout), lambda i: (0, 0)),   # weights resident
            pl.BlockSpec((1, Cout), lambda i: (0, 0)),    # bias resident
        ],
        out_specs=pl.BlockSpec((tm, Cout), lambda i: (i, 0)),
        compiler_params=pltpu.CompilerParams(
            dimension_semantics=("parallel",)),           # shards over v7x's 2 TCs
    )(slab, w, b)
    return out[:M]


# ---------------------------------------------------------------------------
# Glue: im2col patch slab (pure slicing / concat, no FLOPs)
# ---------------------------------------------------------------------------
def _im2col(xp, K, stride, Ho, Wo):
    """xp: padded NHWC input -> (N*Ho*Wo, K*K*Cin) slab, tap-major / channel-minor."""
    N, _, _, Cin = xp.shape
    cols = []
    for kh in range(K):
        for kw in range(K):
            cols.append(xp[:, kh:kh + stride * (Ho - 1) + 1:stride,
                           kw:kw + stride * (Wo - 1) + 1:stride, :])
    patches = jnp.concatenate(cols, axis=-1)              # (N, Ho, Wo, K*K*Cin)
    return patches.reshape(N * Ho * Wo, K * K * Cin)


# ---------------------------------------------------------------------------
# Layer wrappers (NHWC activations, PyTorch-layout weights)
# ---------------------------------------------------------------------------
def conv2d(x, w_oihw, b, stride, padding=1):
    """nn.Conv2d equivalent. x: NHWC f32, w_oihw: (Cout, Cin, K, K)."""
    N, H, W, Cin = x.shape
    Cout, _, K, _ = w_oihw.shape
    Ho = (H + 2 * padding - K) // stride + 1
    Wo = (W + 2 * padding - K) // stride + 1
    xp = jnp.pad(x.astype(jnp.bfloat16),
                 ((0, 0), (padding, padding), (padding, padding), (0, 0)))
    slab = _im2col(xp, K, stride, Ho, Wo)                               # (M, K*K*Cin)
    wm = jnp.transpose(w_oihw, (2, 3, 1, 0)).reshape(K * K * Cin, Cout)  # (kh,kw,ci) x co
    out = _matmul_bias(slab, wm, b)
    return out.reshape(N, Ho, Wo, Cout)


def conv_transpose2d(x, w_ct, b):
    """nn.ConvTranspose2d(k=3, s=2, p=1, output_padding=1) equivalent.
    x: NHWC f32, w_ct: (Cin, Cout, 3, 3).

    Realized as a stride-1 2x2 "sub-pixel" conv: output parity (r, s) only ever uses
      r=0: kh=1 @ row j        |  r=1: kh=2 @ row j, kh=0 @ row j+1      (same for w),
    so the four phases are packed into 4*Cout output channels of one matmul and then
    interleaved (pixel shuffle) in XLA glue. No zero-insertion, lane-dense output.
    """
    N, H, W, Cin = x.shape
    Cout = w_ct.shape[1]

    # (parity r, window offset dh) -> kh of the original 3x3 weight; (0,1) contributes 0.
    tap = {(0, 0): 1, (1, 0): 2, (1, 1): 0}
    w2 = jnp.zeros((2, 2, Cin, 2, 2, Cout), w_ct.dtype)   # (dh, dw, ci, r, s, co)
    for (r, dh), kh in tap.items():
        for (s, dw), kw in tap.items():
            w2 = w2.at[dh, dw, :, r, s, :].set(w_ct[:, :, kh, kw])
    w2 = w2.reshape(4 * Cin, 4 * Cout)                    # contraction (dh,dw,ci), out (r,s,co)

    xp = jnp.pad(x.astype(jnp.bfloat16), ((0, 0), (0, 1), (0, 1), (0, 0)))  # high-side pad
    slab = _im2col(xp, 2, 1, H, W)                        # (N*H*W, 4*Cin)
    b4 = jnp.tile(b, 4)                                   # bias per phase, (4*Cout,)

    out = _matmul_bias(slab, w2, b4).reshape(N, H, W, 2, 2, Cout)   # (n, j, l, r, s, c)
    out = jnp.transpose(out, (0, 1, 3, 2, 4, 5)).reshape(N, 2 * H, 2 * W, Cout)
    return out


# ---------------------------------------------------------------------------
# Full CNN forward (Pallas) and parameter init
# ---------------------------------------------------------------------------
def cnn_forward(x_nchw, p):
    x = jnp.transpose(x_nchw, (0, 2, 3, 1))                      # NCHW -> NHWC
    x = conv2d(x, p["conv1_w"], p["conv1_b"], stride=1)
    body = x
    x = conv2d(x, p["down1_w"], p["down1_b"], stride=2)
    x = conv2d(x, p["down2_w"], p["down2_b"], stride=2)
    x = conv_transpose2d(x, p["up1_w"], p["up1_b"])
    x = conv_transpose2d(x, p["up2_w"], p["up2_b"])
    x = jnp.concatenate([x, body], axis=-1)                      # torch.cat(dim=1)
    return jnp.transpose(x, (0, 3, 1, 2))                        # NHWC -> NCHW


def init_params(key):
    ks = jax.random.split(key, 10)

    def w(k, shape, fan_in):
        return (jax.random.normal(k, shape, jnp.float32) / jnp.sqrt(fan_in)).astype(jnp.float32)

    return {
        # Conv2d weights: (Cout, Cin, K, K)
        "conv1_w": w(ks[0], (64, 3, 3, 3), 3 * 9),   "conv1_b": w(ks[1], (64,), 9.0),
        "down1_w": w(ks[2], (32, 64, 3, 3), 64 * 9), "down1_b": w(ks[3], (32,), 9.0),
        "down2_w": w(ks[4], (16, 32, 3, 3), 32 * 9), "down2_b": w(ks[5], (16,), 9.0),
        # ConvTranspose2d weights: (Cin, Cout, K, K)
        "up1_w": w(ks[6], (16, 32, 3, 3), 16 * 9),   "up1_b": w(ks[7], (32,), 9.0),
        "up2_w": w(ks[8], (32, 64, 3, 3), 32 * 9),   "up2_b": w(ks[9], (64,), 9.0),
    }


# ---------------------------------------------------------------------------
# Pure-JAX reference (lax convs). `op_dtype=bf16` gives a precision-matched
# reference (bf16 operands, f32 accumulation) for a tight functional check.
# ---------------------------------------------------------------------------
def ref_forward(x_nchw, p, op_dtype=jnp.float32):
    dn = ("NHWC", "HWIO", "NHWC")

    def conv(x, w_oihw, b, s):
        w = jnp.transpose(w_oihw, (2, 3, 1, 0))
        return jax.lax.conv_general_dilated(
            x.astype(op_dtype), w.astype(op_dtype), (s, s), [(1, 1), (1, 1)],
            dimension_numbers=dn, preferred_element_type=jnp.float32) + b

    def convT(x, w_iohw, b):
        w = jnp.transpose(jnp.flip(w_iohw, (2, 3)), (2, 3, 0, 1))
        return jax.lax.conv_general_dilated(
            x.astype(op_dtype), w.astype(op_dtype), (1, 1), [(1, 2), (1, 2)],
            lhs_dilation=(2, 2), dimension_numbers=dn,
            preferred_element_type=jnp.float32) + b

    x = jnp.transpose(x_nchw, (0, 2, 3, 1))
    x = conv(x, p["conv1_w"], p["conv1_b"], 1)
    body = x
    x = conv(x, p["down1_w"], p["down1_b"], 2)
    x = conv(x, p["down2_w"], p["down2_b"], 2)
    x = convT(x, p["up1_w"], p["up1_b"])
    x = convT(x, p["up2_w"], p["up2_b"])
    x = jnp.concatenate([x, body], axis=-1)
    return jnp.transpose(x, (0, 3, 1, 2))


if __name__ == "__main__":
    key = jax.random.PRNGKey(0)
    x = jax.random.normal(key, (2, 3, 16, 16), jnp.float32)      # NCHW, like PyTorch
    params = init_params(jax.random.PRNGKey(1))

    fwd = jax.jit(cnn_forward)
    out = jax.block_until_ready(fwd(x, params))
    assert out.shape == (2, 128, 16, 16), out.shape

    # Tight check against a precision-matched reference (same bf16 operands / f32 accum):
    ref_m = jax.block_until_ready(
        jax.jit(lambda a, b: ref_forward(a, b, jnp.bfloat16))(x, params))
    err_m = float(jnp.max(jnp.abs(out - ref_m)))
    assert jnp.allclose(out, ref_m, rtol=2e-3, atol=2e-3), err_m

    # Loose sanity bound vs. the full-f32 reference (covers intentional bf16 quantization):
    ref_f = jax.block_until_ready(
        jax.jit(lambda a, b: ref_forward(a, b, jnp.float32))(x, params))
    err_f = float(jnp.max(jnp.abs(out - ref_f)))
    assert jnp.allclose(out, ref_f, rtol=5e-2, atol=5e-2), err_f

    print("KERNEL_OK")
</pallas_src>

<mosaic_0001>
module attributes {stable_mosaic.version = 11 : i64} {
  func.func @_matmul_bias_kernel(%arg0: i32, %arg1: memref<512x27xbf16, #tpu.memory_space<vmem>>, %arg2: memref<27x64xbf16, #tpu.memory_space<vmem>>, %arg3: memref<1x64xf32, #tpu.memory_space<vmem>>, %arg4: memref<512x64xf32, #tpu.memory_space<vmem>>) attributes {dimension_semantics = [#tpu.dimension_semantics<parallel>], iteration_bounds = array<i64: 1>, scalar_prefetch = 0 : i64, scratch_operands = 0 : i64, tpu.core_type = #tpu.core_type<tc>, window_params = [{transform_indices = @transform_0, window_bounds = array<i64: 512, 27>}, {pipeline_mode = #tpu.pipeline_mode<synchronous>, transform_indices = @transform_1, window_bounds = array<i64: 27, 64>}, {pipeline_mode = #tpu.pipeline_mode<synchronous>, transform_indices = @transform_2, window_bounds = array<i64: 1, 64>}, {transform_indices = @transform_3, window_bounds = array<i64: 512, 64>}]} {
    %c0 = arith.constant 0 : index
    %c0_0 = arith.constant 0 : index
    %0 = vector.load %arg1[%c0, %c0_0] : memref<512x27xbf16, #tpu.memory_space<vmem>>, vector<512x27xbf16>
    %c0_1 = arith.constant 0 : index
    %c0_2 = arith.constant 0 : index
    %1 = vector.load %arg2[%c0_1, %c0_2] : memref<27x64xbf16, #tpu.memory_space<vmem>>, vector<27x64xbf16>
    %cst = arith.constant dense<0.000000e+00> : vector<512x64xf32>
    %2 = tpu.matmul %0, %1, %cst {dimension_numbers = #tpu.dot_dimension_numbers<[1], [0], [0], [1], [0, 0, 1, 1], [], []>} : vector<512x27xbf16>, vector<27x64xbf16>, vector<512x64xf32> -> vector<512x64xf32>
    %c0_3 = arith.constant 0 : index
    %c0_4 = arith.constant 0 : index
    %3 = vector.load %arg3[%c0_3, %c0_4] : memref<1x64xf32, #tpu.memory_space<vmem>>, vector<1x64xf32>
    %4 = vector.broadcast %3 : vector<1x64xf32> to vector<512x64xf32>
    %5 = arith.addf %2, %4 : vector<512x64xf32>
    %c0_5 = arith.constant 0 : index
    %c0_6 = arith.constant 0 : index
    %6 = vector.load %arg4[%c0_5, %c0_6] : memref<512x64xf32, #tpu.memory_space<vmem>>, vector<512x64xf32>
    tpu.vector_store %arg4[%c0_5, %c0_6], %5 {strides = array<i32>} : memref<512x64xf32, #tpu.memory_space<vmem>>, vector<512x64xf32>,
    return
  }
  func.func @transform_0(%arg0: i32) -> (i32, i32) {
    %c0_i32 = arith.constant 0 : i32
    %c0_i32_0 = arith.constant 0 : i32
    return %arg0, %c0_i32 : i32, i32
  }
  func.func @transform_1(%arg0: i32) -> (i32, i32) {
    %c0_i32 = arith.constant 0 : i32
    %c0_i32_0 = arith.constant 0 : i32
    %c0_i32_1 = arith.constant 0 : i32
    return %c0_i32, %c0_i32_0 : i32, i32
  }
  func.func @transform_2(%arg0: i32) -> (i32, i32) {
    %c0_i32 = arith.constant 0 : i32
    %c0_i32_0 = arith.constant 0 : i32
    %c0_i32_1 = arith.constant 0 : i32
    return %c0_i32, %c0_i32_0 : i32, i32
  }
  func.func @transform_3(%arg0: i32) -> (i32, i32) {
    %c0_i32 = arith.constant 0 : i32
    %c0_i32_0 = arith.constant 0 : i32
    return %arg0, %c0_i32 : i32, i32
  }
}

module attributes {stable_mosaic.version = 11 : i64} {
  func.func @_matmul_bias_kernel(%arg0: i32, %arg1: memref<128x576xbf16, #tpu.memory_space<vmem>>, %arg2: memref<576x32xbf16, #tpu.memory_space<vmem>>, %arg3: memref<1x32xf32, #tpu.memory_space<vmem>>, %arg4: memref<128x32xf32, #tpu.memory_space<vmem>>) attributes {dimension_semantics = [#tpu.dimension_semantics<parallel>], iteration_bounds = array<i64: 1>, scalar_prefetch = 0 : i64, scratch_operands = 0 : i64, tpu.core_type = #tpu.core_type<tc>, window_params = [{transform_indices = @transform_0, window_bounds = array<i64: 128, 576>}, {pipeline_mode = #tpu.pipeline_mode<synchronous>, transform_indices = @transform_1, window_bounds = array<i64: 576, 32>}, {pipeline_mode = #tpu.pipeline_mode<synchronous>, transform_indices = @transform_2, window_bounds = array<i64: 1, 32>}, {transform_indices = @transform_3, window_bounds = array<i64: 128, 32>}]} {
    %c0 = arith.constant 0 : index
    %c0_0 = arith.constant 0 : index
    %0 = vector.load %arg1[%c0, %c0_0] : memref<128x576xbf16, #tpu.memory_space<vmem>>, vector<128x576xbf16>
    %c0_1 = arith.constant 0 : index
    %c0_2 = arith.constant 0 : index
    %1 = vector.load %arg2[%c0_1, %c0_2] : memref<576x32xbf16, #tpu.memory_space<vmem>>, vector<576x32xbf16>
    %cst = arith.constant dense<0.000000e+00> : vector<128x32xf32>
    %2 = tpu.matmul %0, %1, %cst {dimension_numbers = #tpu.dot_dimension_numbers<[1], [0], [0], [1], [0, 0, 1, 1], [], []>} : vector<128x576xbf16>, vector<576x32xbf16>, vector<128x32xf32> -> vector<128x32xf32>
    %c0_3 = arith.constant 0 : index
    %c0_4 = arith.constant 0 : index
    %3 = vector.load %arg3[%c0_3, %c0_4] : memref<1x32xf32, #tpu.memory_space<vmem>>, vector<1x32xf32>
    %4 = vector.broadcast %3 : vector<1x32xf32> to vector<128x32xf32>
    %5 = arith.addf %2, %4 : vector<128x32xf32>
    %c0_5 = arith.constant 0 : index
    %c0_6 = arith.constant 0 : index
    %6 = vector.load %arg4[%c0_5, %c0_6] : memref<128x32xf32, #tpu.memory_space<vmem>>, vector<128x32xf32>
    tpu.vector_store %arg4[%c0_5, %c0_6], %5 {strides = array<i32>} : memref<128x32xf32, #tpu.memory_space<vmem>>, vector<128x32xf32>,
    return
  }
  func.func @transform_0(%arg0: i32) -> (i32, i32) {
    %c0_i32 = arith.constant 0 : i32
    %c0_i32_0 = arith.constant 0 : i32
    return %arg0, %c0_i32 : i32, i32
  }
  func.func @transform_1(%arg0: i32) -> (i32, i32) {
    %c0_i32 = arith.constant 0 : i32
    %c0_i32_0 = arith.constant 0 : i32
    %c0_i32_1 = arith.constant 0 : i32
    return %c0_i32, %c0_i32_0 : i32, i32
  }
  func.func @transform_2(%arg0: i32) -> (i32, i32) {
    %c0_i32 = arith.constant 0 : i32
    %c0_i32_0 = arith.constant 0 : i32
    %c0_i32_1 = arith.constant 0 : i32
    return %c0_i32, %c0_i32_0 : i32, i32
  }
  func.func @transform_3(%arg0: i32) -> (i32, i32) {
    %c0_i32 = arith.constant 0 : i32
    %c0_i32_0 = arith.constant 0 : i32
    return %arg0, %c0_i32 : i32, i32
  }
}

module attributes {stable_mosaic.version = 11 : i64} {
  func.func @_matmul_bias_kernel(%arg0: i32, %arg1: memref<32x288xbf16, #tpu.memory_space<vmem>>, %arg2: memref<288x16xbf16, #tpu.memory_space<vmem>>, %arg3: memref<1x16xf32, #tpu.memory_space<vmem>>, %arg4: memref<32x16xf32, #tpu.memory_space<vmem>>) attributes {dimension_semantics = [#tpu.dimension_semantics<parallel>], iteration_bounds = array<i64: 1>, scalar_prefetch = 0 : i64, scratch_operands = 0 : i64, tpu.core_type = #tpu.core_type<tc>, window_params = [{transform_indices = @transform_0, window_bounds = array<i64: 32, 288>}, {pipeline_mode = #tpu.pipeline_mode<synchronous>, transform_indices = @transform_1, window_bounds = array<i64: 288, 16>}, {pipeline_mode = #tpu.pipeline_mode<synchronous>, transform_indices = @transform_2, window_bounds = array<i64: 1, 16>}, {transform_indices = @transform_3, window_bounds = array<i64: 32, 16>}]} {
    %c0 = arith.constant 0 : index
    %c0_0 = arith.constant 0 : index
    %0 = vector.load %arg1[%c0, %c0_0] : memref<32x288xbf16, #tpu.memory_space<vmem>>, vector<32x288xbf16>
    %c0_1 = arith.constant 0 : index
    %c0_2 = arith.constant 0 : index
    %1 = vector.load %arg2[%c0_1, %c0_2] : memref<288x16xbf16, #tpu.memory_space<vmem>>, vector<288x16xbf16>
    %cst = arith.constant dense<0.000000e+00> : vector<32x16xf32>
    %2 = tpu.matmul %0, %1, %cst {dimension_numbers = #tpu.dot_dimension_numbers<[1], [0], [0], [1], [0, 0, 1, 1], [], []>} : vector<32x288xbf16>, vector<288x16xbf16>, vector<32x16xf32> -> vector<32x16xf32>
    %c0_3 = arith.constant 0 : index
    %c0_4 = arith.constant 0 : index
    %3 = vector.load %arg3[%c0_3, %c0_4] : memref<1x16xf32, #tpu.memory_space<vmem>>, vector<1x16xf32>
    %4 = vector.broadcast %3 : vector<1x16xf32> to vector<32x16xf32>
    %5 = arith.addf %2, %4 : vector<32x16xf32>
    %c0_5 = arith.constant 0 : index
    %c0_6 = arith.constant 0 : index
    %6 = vector.load %arg4[%c0_5, %c0_6] : memref<32x16xf32, #tpu.memory_space<vmem>>, vector<32x16xf32>
    tpu.vector_store %arg4[%c0_5, %c0_6], %5 {strides = array<i32>} : memref<32x16xf32, #tpu.memory_space<vmem>>, vector<32x16xf32>,
    return
  }
  func.func @transform_0(%arg0: i32) -> (i32, i32) {
    %c0_i32 = arith.constant 0 : i32
    %c0_i32_0 = arith.constant 0 : i32
    return %arg0, %c0_i32 : i32, i32
  }
  func.func @transform_1(%arg0: i32) -> (i32, i32) {
    %c0_i32 = arith.constant 0 : i32
    %c0_i32_0 = arith.constant 0 : i32
    %c0_i32_1 = arith.constant 0 : i32
    return %c0_i32, %c0_i32_0 : i32, i32
  }
  func.func @transform_2(%arg0: i32) -> (i32, i32) {
    %c0_i32 = arith.constant 0 : i32
    %c0_i32_0 = arith.constant 0 : i32
    %c0_i32_1 = arith.constant 0 : i32
    return %c0_i32, %c0_i32_0 : i32, i32
  }
  func.func @transform_3(%arg0: i32) -> (i32, i32) {
    %c0_i32 = arith.constant 0 : i32
    %c0_i32_0 = arith.constant 0 : i32
    return %arg0, %c0_i32 : i32, i32
  }
}

module attributes {stable_mosaic.version = 11 : i64} {
  func.func @_matmul_bias_kernel(%arg0: i32, %arg1: memref<32x64xbf16, #tpu.memory_space<vmem>>, %arg2: memref<64x128xbf16, #tpu.memory_space<vmem>>, %arg3: memref<1x128xf32, #tpu.memory_space<vmem>>, %arg4: memref<32x128xf32, #tpu.memory_space<vmem>>) attributes {dimension_semantics = [#tpu.dimension_semantics<parallel>], iteration_bounds = array<i64: 1>, scalar_prefetch = 0 : i64, scratch_operands = 0 : i64, tpu.core_type = #tpu.core_type<tc>, window_params = [{transform_indices = @transform_0, window_bounds = array<i64: 32, 64>}, {pipeline_mode = #tpu.pipeline_mode<synchronous>, transform_indices = @transform_1, window_bounds = array<i64: 64, 128>}, {pipeline_mode = #tpu.pipeline_mode<synchronous>, transform_indices = @transform_2, window_bounds = array<i64: 1, 128>}, {transform_indices = @transform_3, window_bounds = array<i64: 32, 128>}]} {
    %c0 = arith.constant 0 : index
    %c0_0 = arith.constant 0 : index
    %0 = vector.load %arg1[%c0, %c0_0] : memref<32x64xbf16, #tpu.memory_space<vmem>>, vector<32x64xbf16>
    %c0_1 = arith.constant 0 : index
    %c0_2 = arith.constant 0 : index
    %1 = vector.load %arg2[%c0_1, %c0_2] : memref<64x128xbf16, #tpu.memory_space<vmem>>, vector<64x128xbf16>
    %cst = arith.constant dense<0.000000e+00> : vector<32x128xf32>
    %2 = tpu.matmul %0, %1, %cst {dimension_numbers = #tpu.dot_dimension_numbers<[1], [0], [0], [1], [0, 0, 1, 1], [], []>} : vector<32x64xbf16>, vector<64x128xbf16>, vector<32x128xf32> -> vector<32x128xf32>
    %c0_3 = arith.constant 0 : index
    %c0_4 = arith.constant 0 : index
    %3 = vector.load %arg3[%c0_3, %c0_4] : memref<1x128xf32, #tpu.memory_space<vmem>>, vector<1x128xf32>
    %4 = vector.broadcast %3 : vector<1x128xf32> to vector<32x128xf32>
    %5 = arith.addf %2, %4 : vector<32x128xf32>
    %c0_5 = arith.constant 0 : index
    %c0_6 = arith.constant 0 : index
    %6 = vector.load %arg4[%c0_5, %c0_6] : memref<32x128xf32, #tpu.memory_space<vmem>>, vector<32x128xf32>
    tpu.vector_store %arg4[%c0_5, %c0_6], %5 {strides = array<i32>} : memref<32x128xf32, #tpu.memory_space<vmem>>, vector<32x128xf32>,
    return
  }
  func.func @transform_0(%arg0: i32) -> (i32, i32) {
    %c0_i32 = arith.constant 0 : i32
    %c0_i32_0 = arith.constant 0 : i32
    return %arg0, %c0_i32 : i32, i32
  }
  func.func @transform_1(%arg0: i32) -> (i32, i32) {
    %c0_i32 = arith.constant 0 : i32
    %c0_i32_0 = arith.constant 0 : i32
    %c0_i32_1 = arith.constant 0 : i32
    return %c0_i32, %c0_i32_0 : i32, i32
  }
  func.func @transform_2(%arg0: i32) -> (i32, i32) {
    %c0_i32 = arith.constant 0 : i32
    %c0_i32_0 = arith.constant 0 : i32
    %c0_i32_1 = arith.constant 0 : i32
    return %c0_i32, %c0_i32_0 : i32, i32
  }
  func.func @transform_3(%arg0: i32) -> (i32, i32) {
    %c0_i32 = arith.constant 0 : i32
    %c0_i32_0 = arith.constant 0 : i32
    return %arg0, %c0_i32 : i32, i32
  }
}

module attributes {stable_mosaic.version = 11 : i64} {
  func.func @_matmul_bias_kernel(%arg0: i32, %arg1: memref<128x128xbf16, #tpu.memory_space<vmem>>, %arg2: memref<128x256xbf16, #tpu.memory_space<vmem>>, %arg3: memref<1x256xf32, #tpu.memory_space<vmem>>, %arg4: memref<128x256xf32, #tpu.memory_space<vmem>>) attributes {dimension_semantics = [#tpu.dimension_semantics<parallel>], iteration_bounds = array<i64: 1>, scalar_prefetch = 0 : i64, scratch_operands = 0 : i64, tpu.core_type = #tpu.core_type<tc>, window_params = [{transform_indices = @transform_0, window_bounds = array<i64: 128, 128>}, {pipeline_mode = #tpu.pipeline_mode<synchronous>, transform_indices = @transform_1, window_bounds = array<i64: 128, 256>}, {pipeline_mode = #tpu.pipeline_mode<synchronous>, transform_indices = @transform_2, window_bounds = array<i64: 1, 256>}, {transform_indices = @transform_3, window_bounds = array<i64: 128, 256>}]} {
    %c0 = arith.constant 0 : index
    %c0_0 = arith.constant 0 : index
    %0 = vector.load %arg1[%c0, %c0_0] : memref<128x128xbf16, #tpu.memory_space<vmem>>, vector<128x128xbf16>
    %c0_1 = arith.constant 0 : index
    %c0_2 = arith.constant 0 : index
    %1 = vector.load %arg2[%c0_1, %c0_2] : memref<128x256xbf16, #tpu.memory_space<vmem>>, vector<128x256xbf16>
    %cst = arith.constant dense<0.000000e+00> : vector<128x256xf32>
    %2 = tpu.matmul %0, %1, %cst {dimension_numbers = #tpu.dot_dimension_numbers<[1], [0], [0], [1], [0, 0, 1, 1], [], []>} : vector<128x128xbf16>, vector<128x256xbf16>, vector<128x256xf32> -> vector<128x256xf32>
    %c0_3 = arith.constant 0 : index
    %c0_4 = arith.constant 0 : index
    %3 = vector.load %arg3[%c0_3, %c0_4] : memref<1x256xf32, #tpu.memory_space<vmem>>, vector<1x256xf32>
    %4 = vector.broadcast %3 : vector<1x256xf32> to vector<128x256xf32>
    %5 = arith.addf %2, %4 : vector<128x256xf32>
    %c0_5 = arith.constant 0 : index
    %c0_6 = arith.constant 0 : index
    %6 = vector.load %arg4[%c0_5, %c0_6] : memref<128x256xf32, #tpu.memory_space<vmem>>, vector<128x256xf32>
    tpu.vector_store %arg4[%c0_5, %c0_6], %5 {strides = array<i32>} : memref<128x256xf32, #tpu.memory_space<vmem>>, vector<128x256xf32>,
    return
  }
  func.func @transform_0(%arg0: i32) -> (i32, i32) {
    %c0_i32 = arith.constant 0 : i32
    %c0_i32_0 = arith.constant 0 : i32
    return %arg0, %c0_i32 : i32, i32
  }
  func.func @transform_1(%arg0: i32) -> (i32, i32) {
    %c0_i32 = arith.constant 0 : i32
    %c0_i32_0 = arith.constant 0 : i32
    %c0_i32_1 = arith.constant 0 : i32
    return %c0_i32, %c0_i32_0 : i32, i32
  }
  func.func @transform_2(%arg0: i32) -> (i32, i32) {
    %c0_i32 = arith.constant 0 : i32
    %c0_i32_0 = arith.constant 0 : i32
    %c0_i32_1 = arith.constant 0 : i32
    return %c0_i32, %c0_i32_0 : i32, i32
  }
  func.func @transform_3(%arg0: i32) -> (i32, i32) {
    %c0_i32 = arith.constant 0 : i32
    %c0_i32_0 = arith.constant 0 : i32
    return %arg0, %c0_i32 : i32, i32
  }
}

</mosaic_0001>

<bundles_post_ra>
// kernel: cnn_forward.5
= control target key start
LH: loop header
LB: loop body
LE: loop exit
PB: predicated region body
PF: predicated region fallthrough
CT: control target
= control target key end

     0   :  { %vm358_vm0 = vcmask 1044480   ;;  %vm359_vm1 = vcmask 1045504   ;;  %vm261_vm2 = vcmask 220160   ;;  %v931_v1 = vmov 65535   ;;  %s1411_s1 = inlined_call_operand.vmem [shape: bf16[27,64], index: 1, kind: input, shape index: {}]   ;;  %s1412_s0 = inlined_call_operand.vmem [shape: bf16[512,27], index: 0, kind: input, shape index: {}]   ;;  %s1413_s2 = inlined_call_operand.vmem [shape: f32[1,64], index: 2, kind: input, shape index: {}]   ;;  %s1414_s3 = inlined_call_operand.vmem [shape: f32[512,64], index: 3, kind: output, shape index: {}]  }
   0x1   :  { %v897_v0 = vld [vmem:[%s1411_s1] sm:$0xff]   ;;  %v360_v2 = vsel %vm358_vm0, 4294967295, %v931_v1  ;;  %v898_v3 = vld [vmem:[%s1411_s1 + $0x8] sm:$0x3f]   ;;  %v903_v10 = vld [vmem:[%s1412_s0 + $0x10] sm:$0xff]   ;;  %vm654_vm3 = vcmask 523264  }
   0x2   :  { %824 = vmatprep.subr.bf16.mxu0 %v897_v0  ;;  %892 = vmatprep.subr.bf16.mxu1 %v897_v0  ;;  %v361_v4 = vsel %vm359_vm1, %v360_v2, 0  ;;  %v899_v5 = vld [vmem:[%s1412_s0] sm:$0xff]   ;;  %v901_v8 = vld [vmem:[%s1412_s0 + $0x8] sm:$0xff]   ;;  %v904_v11 = vld [vmem:[%s1412_s0 + $0x90] sm:$0xff]  }
   0x3   :  { %825 = vmatpush3.bf16.msra.mxu0 %v897_v0  ;;  %894 = vmatpush3.bf16.msra.mxu1 %v897_v0  ;;  %v363_v6 = vand.u32 %v898_v3, %v361_v4  ;;  %v900_v7 = vld [vmem:[%s1412_s0 + $0x80] sm:$0xff]   ;;  %v902_v9 = vld [vmem:[%s1412_s0 + $0x88] sm:$0xff]   ;;  %v905_v12 = vld [vmem:[%s1412_s0 + $0x18] sm:$0xff]  }
   0x4   :  { %828 = vmatprep.mubr.msk.bf16.mxu0 %vm261_vm2, %v899_v5  ;;  %860 = vmatprep.mubr.msk.bf16.mxu1 %vm261_vm2, %v900_v7  ;;  %v906_v13 = vld [vmem:[%s1412_s0 + $0x98] sm:$0xff]   ;;  %v907_v14 = vld [vmem:[%s1412_s0 + $0x20] sm:$0xff]   ;;  %v909_v16 = vld [vmem:[%s1412_s0 + $0x28] sm:$0xff]  }
   0x5   :  { %826 = vmatprep.subr.bf16.mxu0 %v363_v6  ;;  %893 = vmatprep.subr.bf16.mxu1 %v363_v6  ;;  %v908_v15 = vld [vmem:[%s1412_s0 + $0xa0] sm:$0xff]   ;;  %v910_v17 = vld [vmem:[%s1412_s0 + $0xa8] sm:$0xff]   ;;  %v911_v18 = vld [vmem:[%s1412_s0 + $0x30] sm:$0xff]  }
   0x6   :  { %v912_v19 = vld [vmem:[%s1412_s0 + $0xb0] sm:$0xff]   ;;  %v913_v20 = vld [vmem:[%s1412_s0 + $0x38] sm:$0xff]   ;;  %v915_v22 = vld [vmem:[%s1412_s0 + $0x40] sm:$0xff]  }
   0x7   :  { %827 = vmatpush3.bf16.msra.mxu0 %v363_v6  ;;  %895 = vmatpush3.bf16.msra.mxu1 %v363_v6  ;;  %v914_v21 = vld [vmem:[%s1412_s0 + $0xb8] sm:$0xff]   ;;  %v916_v23 = vld [vmem:[%s1412_s0 + $0xc0] sm:$0xff]   ;;  %v917_v24 = vld [vmem:[%s1412_s0 + $0x48] sm:$0xff]  }
   0x8   :  { %v918_v25 = vld [vmem:[%s1412_s0 + $0xc8] sm:$0xff]   ;;  %v919_v26 = vld [vmem:[%s1412_s0 + $0x50] sm:$0xff]   ;;  %v921_v28 = vld [vmem:[%s1412_s0 + $0x58] sm:$0xff]  }
   0x9   :  { %v920_v27 = vld [vmem:[%s1412_s0 + $0xd0] sm:$0xff]   ;;  %v922_v29 = vld [vmem:[%s1412_s0 + $0xd8] sm:$0xff]   ;;  %v923_v30 = vld [vmem:[%s1412_s0 + $0x60] sm:$0xff]  }
   0xa   :  { %829 = vmatmul.mubr.msk.bf16.vlgmr.msra.gmra.mrb[0].mxu0 %vm261_vm2, %v901_v8  ;;  %861 = vmatmul.mubr.msk.bf16.vlgmr.msra.gmra.mrb[0].mxu1 %vm261_vm2, %v902_v9  ;;  %v924_v31 = vld [vmem:[%s1412_s0 + $0xe0] sm:$0xff]   ;;  %v925_v32 = vld [vmem:[%s1412_s0 + $0x68] sm:$0xff]   ;;  %v927_v34 = vld [vmem:[%s1412_s0 + $0x70] sm:$0xff]  }
   0xb   :  { %832 = vmatprep.mubr.msk.bf16.mxu0 %vm261_vm2, %v903_v10  ;;  %864 = vmatprep.mubr.msk.bf16.mxu1 %vm261_vm2, %v904_v11  ;;  %v926_v33 = vld [vmem:[%s1412_s0 + $0xe8] sm:$0xff]   ;;  %v928_v35 = vld [vmem:[%s1412_s0 + $0xf0] sm:$0xff]   ;;  %v929_v36 = vld [vmem:[%s1412_s0 + $0x78] sm:$0xff]  }
   0xc   :  { %v930_v37 = vld [vmem:[%s1412_s0 + $0xf8] sm:$0xff]   ;;  %v1089_v38 = vld [vmem:[%s1413_s2] ss:$0 sm:$0xff] }
  0x12   :  { %833 = vmatmul.mubr.msk.bf16.gmra.mrb[4].mxu0 %vm261_vm2, %v905_v12  ;;  %865 = vmatmul.mubr.msk.bf16.gmra.mrb[4].mxu1 %vm261_vm2, %v906_v13 }
  0x13   :  { %836 = vmatprep.mubr.msk.bf16.mxu0 %vm261_vm2, %v907_v14  ;;  %868 = vmatprep.mubr.msk.bf16.mxu1 %vm261_vm2, %v908_v15 }
  0x1a   :  { %837 = vmatmul.mubr.msk.bf16.gmra.mrb[8].mxu0 %vm261_vm2, %v909_v16  ;;  %869 = vmatmul.mubr.msk.bf16.gmra.mrb[8].mxu1 %vm261_vm2, %v910_v17 }
  0x1b   :  { %840 = vmatprep.mubr.msk.bf16.mxu0 %vm261_vm2, %v911_v18  ;;  %872 = vmatprep.mubr.msk.bf16.mxu1 %vm261_vm2, %v912_v19 }
  0x22   :  { %841 = vmatmul.mubr.msk.bf16.gmra.mrb[12].mxu0 %vm261_vm2, %v913_v20  ;;  %873 = vmatmul.mubr.msk.bf16.gmra.mrb[12].mxu1 %vm261_vm2, %v914_v21 }
  0x23   :  { %844 = vmatprep.mubr.msk.bf16.mxu0 %vm261_vm2, %v915_v22  ;;  %876 = vmatprep.mubr.msk.bf16.mxu1 %vm261_vm2, %v916_v23 }
  0x2a   :  { %845 = vmatmul.mubr.msk.bf16.gmra.mrb[16].mxu0 %vm261_vm2, %v917_v24  ;;  %877 = vmatmul.mubr.msk.bf16.gmra.mrb[16].mxu1 %vm261_vm2, %v918_v25 }
  0x2b   :  { %848 = vmatprep.mubr.msk.bf16.mxu0 %vm261_vm2, %v919_v26  ;;  %880 = vmatprep.mubr.msk.bf16.mxu1 %vm261_vm2, %v920_v27 }
  0x32   :  { %849 = vmatmul.mubr.msk.bf16.gmra.mrb[20].mxu0 %vm261_vm2, %v921_v28  ;;  %881 = vmatmul.mubr.msk.bf16.gmra.mrb[20].mxu1 %vm261_vm2, %v922_v29 }
  0x33   :  { %852 = vmatprep.mubr.msk.bf16.mxu0 %vm261_vm2, %v923_v30  ;;  %884 = vmatprep.mubr.msk.bf16.mxu1 %vm261_vm2, %v924_v31 }
  0x3a   :  { %853 = vmatmul.mubr.msk.bf16.gmra.mrb[24].mxu0 %vm261_vm2, %v925_v32  ;;  %885 = vmatmul.mubr.msk.bf16.gmra.mrb[24].mxu1 %vm261_vm2, %v926_v33 }
  0x3b   :  { %856 = vmatprep.mubr.msk.bf16.mxu0 %vm261_vm2, %v927_v34  ;;  %888 = vmatprep.mubr.msk.bf16.mxu1 %vm261_vm2, %v928_v35 }
  0x42   :  { %857 = vmatmul.mubr.msk.bf16.gmra.mrb[28].mxu0 %vm261_vm2, %v929_v36  ;;  %889 = vmatmul.mubr.msk.bf16.gmra.mrb[28].mxu1 %vm261_vm2, %v930_v37 }
  0xdd   :  { %v830_v39 = vpop.f32.mrb[0].mxu0  ;;  %v862_v40 = vpop.f32.mrb[0].mxu1 }
  0xde   :  { %v408_v41 = vadd.f32 %v830_v39, %v1089_v38  ;;  %v536_v42 = vadd.f32 %v862_v40, %v1089_v38  ;;  %v399_v43 = vpop.f32.mrb[1].mxu0  ;;  %v527_v44 = vpop.f32.mrb[1].mxu1 }
  0xdf   :  { %v400_v45 = vadd.f32 %v1089_v38, %v399_v43  ;;  %v528_v46 = vadd.f32 %v1089_v38, %v527_v44  ;;  %v831_v47 = vpop.f32.mrb[2].mxu0  ;;  %v863_v48 = vpop.f32.mrb[2].mxu1 }
  0xe0   :  { %657 = vst.msk [vmem:[%s1414_s3 + $0x10] sm:$0xff] %vm654_vm3, %v408_v41  ;;  %689 = vst.msk [vmem:[%s1414_s3 + $0x110] sm:$0xff] %vm654_vm3, %v536_v42  ;;  %v411_v49 = vadd.f32 %v831_v47, %v1089_v38  ;;  %v539_v50 = vadd.f32 %v863_v48, %v1089_v38  ;;  %v402_v51 = vpop.f32.mrb[3].mxu0  ;;  %v530_v52 = vpop.f32.mrb[3].mxu1 }
  0xe1   :  { %655 = vst.msk [vmem:[%s1414_s3] sm:$0xff] %vm654_vm3, %v400_v45  ;;  %687 = vst.msk [vmem:[%s1414_s3 + $0x100] sm:$0xff] %vm654_vm3, %v528_v46  ;;  %v403_v53 = vadd.f32 %v1089_v38, %v402_v51  ;;  %v531_v54 = vadd.f32 %v1089_v38, %v530_v52 }
  0xe2   :  { %658 = vst.msk [vmem:[%s1414_s3 + $0x18] sm:$0xff] %vm654_vm3, %v411_v49  ;;  %690 = vst.msk [vmem:[%s1414_s3 + $0x118] sm:$0xff] %vm654_vm3, %v539_v50 }
  0xe3   :  { %656 = vst.msk [vmem:[%s1414_s3 + $0x8] sm:$0xff] %vm654_vm3, %v403_v53  ;;  %688 = vst.msk [vmem:[%s1414_s3 + $0x108] sm:$0xff] %vm654_vm3, %v531_v54 }
  0xe5   :  { %v834_v55 = vpop.f32.mrb[4].mxu0  ;;  %v866_v56 = vpop.f32.mrb[4].mxu1 }
  0xe6   :  { %v424_v57 = vadd.f32 %v834_v55, %v1089_v38  ;;  %v552_v58 = vadd.f32 %v866_v56, %v1089_v38  ;;  %v415_v59 = vpop.f32.mrb[5].mxu0  ;;  %v543_v60 = vpop.f32.mrb[5].mxu1 }
  0xe7   :  { %v416_v61 = vadd.f32 %v1089_v38, %v415_v59  ;;  %v544_v62 = vadd.f32 %v1089_v38, %v543_v60  ;;  %v835_v63 = vpop.f32.mrb[6].mxu0  ;;  %v867_v0 = vpop.f32.mrb[6].mxu1 }
  0xe8   :  { %661 = vst.msk [vmem:[%s1414_s3 + $0x30] sm:$0xff] %vm654_vm3, %v424_v57  ;;  %693 = vst.msk [vmem:[%s1414_s3 + $0x130] sm:$0xff] %vm654_vm3, %v552_v58  ;;  %v427_v1 = vadd.f32 %v835_v63, %v1089_v38  ;;  %v555_v2 = vadd.f32 %v867_v0, %v1089_v38  ;;  %v418_v3 = vpop.f32.mrb[7].mxu0  ;;  %v546_v4 = vpop.f32.mrb[7].mxu1 }
  0xe9   :  { %659 = vst.msk [vmem:[%s1414_s3 + $0x20] sm:$0xff] %vm654_vm3, %v416_v61  ;;  %691 = vst.msk [vmem:[%s1414_s3 + $0x120] sm:$0xff] %vm654_vm3, %v544_v62  ;;  %v419_v5 = vadd.f32 %v1089_v38, %v418_v3  ;;  %v547_v6 = vadd.f32 %v1089_v38, %v546_v4 }
  0xea   :  { %662 = vst.msk [vmem:[%s1414_s3 + $0x38] sm:$0xff] %vm654_vm3, %v427_v1  ;;  %694 = vst.msk [vmem:[%s1414_s3 + $0x138] sm:$0xff] %vm654_vm3, %v555_v2 }
  0xeb   :  { %660 = vst.msk [vmem:[%s1414_s3 + $0x28] sm:$0xff] %vm654_vm3, %v419_v5  ;;  %692 = vst.msk [vmem:[%s1414_s3 + $0x128] sm:$0xff] %vm654_vm3, %v547_v6 }
  0xed   :  { %v838_v7 = vpop.f32.mrb[8].mxu0  ;;  %v870_v8 = vpop.f32.mrb[8].mxu1 }
  0xee   :  { %v440_v9 = vadd.f32 %v838_v7, %v1089_v38  ;;  %v568_v10 = vadd.f32 %v870_v8, %v1089_v38  ;;  %v431_v11 = vpop.f32.mrb[9].mxu0  ;;  %v559_v12 = vpop.f32.mrb[9].mxu1 }
  0xef   :  { %v432_v13 = vadd.f32 %v1089_v38, %v431_v11  ;;  %v560_v14 = vadd.f32 %v1089_v38, %v559_v12  ;;  %v839_v15 = vpop.f32.mrb[10].mxu0  ;;  %v871_v16 = vpop.f32.mrb[10].mxu1 }
  0xf0   :  { %665 = vst.msk [vmem:[%s1414_s3 + $0x50] sm:$0xff] %vm654_vm3, %v440_v9  ;;  %697 = vst.msk [vmem:[%s1414_s3 + $0x150] sm:$0xff] %vm654_vm3, %v568_v10  ;;  %v443_v17 = vadd.f32 %v839_v15, %v1089_v38  ;;  %v571_v18 = vadd.f32 %v871_v16, %v1089_v38  ;;  %v434_v19 = vpop.f32.mrb[11].mxu0  ;;  %v562_v20 = vpop.f32.mrb[11].mxu1 }
  0xf1   :  { %663 = vst.msk [vmem:[%s1414_s3 + $0x40] sm:$0xff] %vm654_vm3, %v432_v13  ;;  %695 = vst.msk [vmem:[%s1414_s3 + $0x140] sm:$0xff] %vm654_vm3, %v560_v14  ;;  %v435_v21 = vadd.f32 %v1089_v38, %v434_v19  ;;  %v563_v22 = vadd.f32 %v1089_v38, %v562_v20 }
  0xf2   :  { %666 = vst.msk [vmem:[%s1414_s3 + $0x58] sm:$0xff] %vm654_vm3, %v443_v17  ;;  %698 = vst.msk [vmem:[%s1414_s3 + $0x158] sm:$0xff] %vm654_vm3, %v571_v18 }
  0xf3   :  { %664 = vst.msk [vmem:[%s1414_s3 + $0x48] sm:$0xff] %vm654_vm3, %v435_v21  ;;  %696 = vst.msk [vmem:[%s1414_s3 + $0x148] sm:$0xff] %vm654_vm3, %v563_v22 }
  0xf5   :  { %v842_v23 = vpop.f32.mrb[12].mxu0  ;;  %v874_v24 = vpop.f32.mrb[12].mxu1 }
  0xf6   :  { %v456_v25 = vadd.f32 %v842_v23, %v1089_v38  ;;  %v584_v26 = vadd.f32 %v874_v24, %v1089_v38  ;;  %v447_v27 = vpop.f32.mrb[13].mxu0  ;;  %v575_v28 = vpop.f32.mrb[13].mxu1 }
  0xf7   :  { %v448_v29 = vadd.f32 %v1089_v38, %v447_v27  ;;  %v576_v30 = vadd.f32 %v1089_v38, %v575_v28  ;;  %v843_v31 = vpop.f32.mrb[14].mxu0  ;;  %v875_v32 = vpop.f32.mrb[14].mxu1 }
  0xf8   :  { %669 = vst.msk [vmem:[%s1414_s3 + $0x70] sm:$0xff] %vm654_vm3, %v456_v25  ;;  %701 = vst.msk [vmem:[%s1414_s3 + $0x170] sm:$0xff] %vm654_vm3, %v584_v26  ;;  %v459_v33 = vadd.f32 %v843_v31, %v1089_v38  ;;  %v587_v34 = vadd.f32 %v875_v32, %v1089_v38  ;;  %v450_v35 = vpop.f32.mrb[15].mxu0  ;;  %v578_v36 = vpop.f32.mrb[15].mxu1 }
  0xf9   :  { %667 = vst.msk [vmem:[%s1414_s3 + $0x60] sm:$0xff] %vm654_vm3, %v448_v29  ;;  %699 = vst.msk [vmem:[%s1414_s3 + $0x160] sm:$0xff] %vm654_vm3, %v576_v30  ;;  %v451_v37 = vadd.f32 %v1089_v38, %v450_v35  ;;  %v579_v39 = vadd.f32 %v1089_v38, %v578_v36 }
  0xfa   :  { %670 = vst.msk [vmem:[%s1414_s3 + $0x78] sm:$0xff] %vm654_vm3, %v459_v33  ;;  %702 = vst.msk [vmem:[%s1414_s3 + $0x178] sm:$0xff] %vm654_vm3, %v587_v34 }
  0xfb   :  { %668 = vst.msk [vmem:[%s1414_s3 + $0x68] sm:$0xff] %vm654_vm3, %v451_v37  ;;  %700 = vst.msk [vmem:[%s1414_s3 + $0x168] sm:$0xff] %vm654_vm3, %v579_v39 }
  0xfd   :  { %v846_v40 = vpop.f32.mrb[16].mxu0  ;;  %v878_v41 = vpop.f32.mrb[16].mxu1 }
  0xfe   :  { %v472_v42 = vadd.f32 %v846_v40, %v1089_v38  ;;  %v600_v43 = vadd.f32 %v878_v41, %v1089_v38  ;;  %v463_v44 = vpop.f32.mrb[17].mxu0  ;;  %v591_v45 = vpop.f32.mrb[17].mxu1 }
  0xff   :  { %v464_v46 = vadd.f32 %v1089_v38, %v463_v44  ;;  %v592_v47 = vadd.f32 %v1089_v38, %v591_v45  ;;  %v847_v48 = vpop.f32.mrb[18].mxu0  ;;  %v879_v49 = vpop.f32.mrb[18].mxu1 }
 0x100   :  { %673 = vst.msk [vmem:[%s1414_s3 + $0x90] sm:$0xff] %vm654_vm3, %v472_v42  ;;  %705 = vst.msk [vmem:[%s1414_s3 + $0x190] sm:$0xff] %vm654_vm3, %v600_v43  ;;  %v475_v50 = vadd.f32 %v847_v48, %v1089_v38  ;;  %v603_v51 = vadd.f32 %v879_v49, %v1089_v38  ;;  %v466_v52 = vpop.f32.mrb[19].mxu0  ;;  %v594_v53 = vpop.f32.mrb[19].mxu1 }
 0x101   :  { %671 = vst.msk [vmem:[%s1414_s3 + $0x80] sm:$0xff] %vm654_vm3, %v464_v46  ;;  %703 = vst.msk [vmem:[%s1414_s3 + $0x180] sm:$0xff] %vm654_vm3, %v592_v47  ;;  %v467_v54 = vadd.f32 %v1089_v38, %v466_v52  ;;  %v595_v55 = vadd.f32 %v1089_v38, %v594_v53 }
 0x102   :  { %674 = vst.msk [vmem:[%s1414_s3 + $0x98] sm:$0xff] %vm654_vm3, %v475_v50  ;;  %706 = vst.msk [vmem:[%s1414_s3 + $0x198] sm:$0xff] %vm654_vm3, %v603_v51 }
 0x103   :  { %672 = vst.msk [vmem:[%s1414_s3 + $0x88] sm:$0xff] %vm654_vm3, %v467_v54  ;;  %704 = vst.msk [vmem:[%s1414_s3 + $0x188] sm:$0xff] %vm654_vm3, %v595_v55 }
 0x105   :  { %v850_v56 = vpop.f32.mrb[20].mxu0  ;;  %v882_v57 = vpop.f32.mrb[20].mxu1 }
 0x106   :  { %v488_v58 = vadd.f32 %v850_v56, %v1089_v38  ;;  %v616_v59 = vadd.f32 %v882_v57, %v1089_v38  ;;  %v479_v60 = vpop.f32.mrb[21].mxu0  ;;  %v607_v61 = vpop.f32.mrb[21].mxu1 }
 0x107   :  { %v480_v62 = vadd.f32 %v1089_v38, %v479_v60  ;;  %v608_v63 = vadd.f32 %v1089_v38, %v607_v61  ;;  %v851_v0 = vpop.f32.mrb[22].mxu0  ;;  %v883_v1 = vpop.f32.mrb[22].mxu1 }
 0x108   :  { %677 = vst.msk [vmem:[%s1414_s3 + $0xb0] sm:$0xff] %vm654_vm3, %v488_v58  ;;  %709 = vst.msk [vmem:[%s1414_s3 + $0x1b0] sm:$0xff] %vm654_vm3, %v616_v59  ;;  %v491_v2 = vadd.f32 %v851_v0, %v1089_v38  ;;  %v619_v3 = vadd.f32 %v883_v1, %v1089_v38  ;;  %v482_v4 = vpop.f32.mrb[23].mxu0  ;;  %v610_v5 = vpop.f32.mrb[23].mxu1 }
 0x109   :  { %675 = vst.msk [vmem:[%s1414_s3 + $0xa0] sm:$0xff] %vm654_vm3, %v480_v62  ;;  %707 = vst.msk [vmem:[%s1414_s3 + $0x1a0] sm:$0xff] %vm654_vm3, %v608_v63  ;;  %v483_v6 = vadd.f32 %v1089_v38, %v482_v4  ;;  %v611_v7 = vadd.f32 %v1089_v38, %v610_v5 }
 0x10a   :  { %678 = vst.msk [vmem:[%s1414_s3 + $0xb8] sm:$0xff] %vm654_vm3, %v491_v2  ;;  %710 = vst.msk [vmem:[%s1414_s3 + $0x1b8] sm:$0xff] %vm654_vm3, %v619_v3 }
 0x10b   :  { %676 = vst.msk [vmem:[%s1414_s3 + $0xa8] sm:$0xff] %vm654_vm3, %v483_v6  ;;  %708 = vst.msk [vmem:[%s1414_s3 + $0x1a8] sm:$0xff] %vm654_vm3, %v611_v7 }
 0x10d   :  { %v854_v8 = vpop.f32.mrb[24].mxu0  ;;  %v886_v9 = vpop.f32.mrb[24].mxu1 }
 0x10e   :  { %v504_v10 = vadd.f32 %v854_v8, %v1089_v38  ;;  %v632_v11 = vadd.f32 %v886_v9, %v1089_v38  ;;  %v495_v12 = vpop.f32.mrb[25].mxu0  ;;  %v623_v13 = vpop.f32.mrb[25].mxu1 }
 0x10f   :  { %v496_v14 = vadd.f32 %v1089_v38, %v495_v12  ;;  %v624_v15 = vadd.f32 %v1089_v38, %v623_v13  ;;  %v855_v16 = vpop.f32.mrb[26].mxu0  ;;  %v887_v17 = vpop.f32.mrb[26].mxu1 }
 0x110   :  { %681 = vst.msk [vmem:[%s1414_s3 + $0xd0] sm:$0xff] %vm654_vm3, %v504_v10  ;;  %713 = vst.msk [vmem:[%s1414_s3 + $0x1d0] sm:$0xff] %vm654_vm3, %v632_v11  ;;  %v507_v18 = vadd.f32 %v855_v16, %v1089_v38  ;;  %v635_v19 = vadd.f32 %v887_v17, %v1089_v38  ;;  %v498_v20 = vpop.f32.mrb[27].mxu0  ;;  %v626_v21 = vpop.f32.mrb[27].mxu1 }
 0x111   :  { %679 = vst.msk [vmem:[%s1414_s3 + $0xc0] sm:$0xff] %vm654_vm3, %v496_v14  ;;  %711 = vst.msk [vmem:[%s1414_s3 + $0x1c0] sm:$0xff] %vm654_vm3, %v624_v15  ;;  %v499_v22 = vadd.f32 %v1089_v38, %v498_v20  ;;  %v627_v23 = vadd.f32 %v1089_v38, %v626_v21 }
 0x112   :  { %682 = vst.msk [vmem:[%s1414_s3 + $0xd8] sm:$0xff] %vm654_vm3, %v507_v18  ;;  %714 = vst.msk [vmem:[%s1414_s3 + $0x1d8] sm:$0xff] %vm654_vm3, %v635_v19 }
 0x113   :  { %680 = vst.msk [vmem:[%s1414_s3 + $0xc8] sm:$0xff] %vm654_vm3, %v499_v22  ;;  %712 = vst.msk [vmem:[%s1414_s3 + $0x1c8] sm:$0xff] %vm654_vm3, %v627_v23 }
 0x115   :  { %v858_v24 = vpop.f32.mrb[28].mxu0  ;;  %v890_v25 = vpop.f32.mrb[28].mxu1 }
 0x116   :  { %v520_v26 = vadd.f32 %v858_v24, %v1089_v38  ;;  %v648_v27 = vadd.f32 %v890_v25, %v1089_v38  ;;  %v511_v28 = vpop.f32.mrb[29].mxu0  ;;  %v639_v29 = vpop.f32.mrb[29].mxu1 }
 0x117   :  { %v512_v30 = vadd.f32 %v1089_v38, %v511_v28  ;;  %v640_v31 = vadd.f32 %v1089_v38, %v639_v29  ;;  %v859_v32 = vpop.f32.mrb[30].mxu0  ;;  %v891_v33 = vpop.f32.mrb[30].mxu1 }
 0x118   :  { %685 = vst.msk [vmem:[%s1414_s3 + $0xf0] sm:$0xff] %vm654_vm3, %v520_v26  ;;  %717 = vst.msk [vmem:[%s1414_s3 + $0x1f0] sm:$0xff] %vm654_vm3, %v648_v27  ;;  %v523_v34 = vadd.f32 %v859_v32, %v1089_v38  ;;  %v651_v35 = vadd.f32 %v891_v33, %v1089_v38  ;;  %v514_v36 = vpop.f32.mrb[31].mxu0  ;;  %v642_v37 = vpop.f32.mrb[31].mxu1 }
 0x119   :  { %683 = vst.msk [vmem:[%s1414_s3 + $0xe0] sm:$0xff] %vm654_vm3, %v512_v30  ;;  %715 = vst.msk [vmem:[%s1414_s3 + $0x1e0] sm:$0xff] %vm654_vm3, %v640_v31  ;;  %v515_v39 = vadd.f32 %v1089_v38, %v514_v36  ;;  %v643_v40 = vadd.f32 %v1089_v38, %v642_v37 }
 0x11a   :  { %686 = vst.msk [vmem:[%s1414_s3 + $0xf8] sm:$0xff] %vm654_vm3, %v523_v34  ;;  %718 = vst.msk [vmem:[%s1414_s3 + $0x1f8] sm:$0xff] %vm654_vm3, %v651_v35 }
 0x11b   :  { %684 = vst.msk [vmem:[%s1414_s3 + $0xe8] sm:$0xff] %vm654_vm3, %v515_v39  ;;  %716 = vst.msk [vmem:[%s1414_s3 + $0x1e8] sm:$0xff] %vm654_vm3, %v643_v40 }

// kernel: cnn_forward.6
= control target key start
LH: loop header
LB: loop body
LE: loop exit
PB: predicated region body
PF: predicated region fallthrough
CT: control target
= control target key end

     0   :  { %vm558_vm0 = vcmask 523264   ;;  %vm874_vm1 = vcmask 261120   ;;  %s1612_s1 = inlined_call_operand.vmem [shape: bf16[576,32], index: 1, kind: input, shape index: {}]   ;;  %s1613_s0 = inlined_call_operand.vmem [shape: bf16[128,576], index: 0, kind: input, shape index: {}]   ;;  %s1614_s2 = inlined_call_operand.vmem [shape: f32[1,32], index: 2, kind: input, shape index: {}]   ;;  %s1615_s3 = inlined_call_operand.vmem [shape: f32[128,32], index: 3, kind: output, shape index: {}]  }
   0x1   :  { %v1152_v0 = vld [vmem:[%s1612_s1 + $0x40] sm:$0xff]   ;;  %v1156_v4 = vld [vmem:[%s1612_s1 + $0x48] sm:$0xff]   ;;  %v1160_v8 = vld [vmem:[%s1612_s1 + $0x50] sm:$0xff]  }
   0x2   :  { %v1153_v1 = vld [vmem:[%s1612_s1 + $0xc0] sm:$0xff]   ;;  %980 = vmatprep.subr.bf16.mxu0 %v1152_v0  ;;  %v1157_v5 = vld [vmem:[%s1612_s1 + $0xc8] sm:$0xff]   ;;  %v1161_v9 = vld [vmem:[%s1612_s1 + $0xd0] sm:$0xff]  }
   0x3   :  { %v1154_v2 = vld [vmem:[%s1612_s1] sm:$0xff]   ;;  %1044 = vmatprep.subr.bf16.mxu1 %v1153_v1  ;;  %v1158_v6 = vld [vmem:[%s1612_s1 + $0x8] sm:$0xff]   ;;  %v1162_v10 = vld [vmem:[%s1612_s1 + $0x10] sm:$0xff]  }
   0x4   :  { %v1155_v3 = vld [vmem:[%s1612_s1 + $0x80] sm:$0xff]   ;;  %981 = vmatpush3.bf16.msra.mxu0 %v1154_v2  ;;  %v1159_v7 = vld [vmem:[%s1612_s1 + $0x88] sm:$0xff]   ;;  %v1163_v11 = vld [vmem:[%s1612_s1 + $0x90] sm:$0xff]  }
   0x5   :  { %1045 = vmatpush3.bf16.msra.mxu1 %v1155_v3  ;;  %982 = vmatprep.subr.bf16.mxu0 %v1156_v4  ;;  %v1164_v12 = vld [vmem:[%s1612_s1 + $0x58] sm:$0xff]   ;;  %v1168_v16 = vld [vmem:[%s1612_s1 + $0x60] sm:$0xff]   ;;  %v1172_v20 = vld [vmem:[%s1612_s1 + $0x68] sm:$0xff]  }
   0x6   :  { %1046 = vmatprep.subr.bf16.mxu1 %v1157_v5  ;;  %v1165_v13 = vld [vmem:[%s1612_s1 + $0xd8] sm:$0xff]   ;;  %v1169_v17 = vld [vmem:[%s1612_s1 + $0xe0] sm:$0xff]   ;;  %v1173_v21 = vld [vmem:[%s1612_s1 + $0xe8] sm:$0xff]  }
   0x7   :  { %v1166_v14 = vld [vmem:[%s1612_s1 + $0x18] sm:$0xff]   ;;  %v1170_v18 = vld [vmem:[%s1612_s1 + $0x20] sm:$0xff]   ;;  %v1174_v22 = vld [vmem:[%s1612_s1 + $0x28] sm:$0xff]  }
   0x8   :  { %983 = vmatpush3.bf16.msra.mxu0 %v1158_v6  ;;  %v1167_v15 = vld [vmem:[%s1612_s1 + $0x98] sm:$0xff]   ;;  %v1171_v19 = vld [vmem:[%s1612_s1 + $0xa0] sm:$0xff]   ;;  %v1175_v23 = vld [vmem:[%s1612_s1 + $0xa8] sm:$0xff]  }
   0x9   :  { %1047 = vmatpush3.bf16.msra.mxu1 %v1159_v7  ;;  %984 = vmatprep.subr.bf16.mxu0 %v1160_v8  ;;  %v1176_v24 = vld [vmem:[%s1612_s1 + $0x70] sm:$0xff]   ;;  %v1180_v28 = vld [vmem:[%s1612_s1 + $0x78] sm:$0xff]   ;;  %v1189_v35 = vld [vmem:[%s1613_s0 + $0xc] ss:$20 sps:$4 sm:$0xff]  }
   0xa   :  { %1048 = vmatprep.subr.bf16.mxu1 %v1161_v9  ;;  %v1177_v25 = vld [vmem:[%s1612_s1 + $0xf0] sm:$0xff]   ;;  %v1181_v29 = vld [vmem:[%s1612_s1 + $0xf8] sm:$0xff]   ;;  %v1190_v36 = vld [vmem:[%s1612_s1 + $0x100] sm:$0xff]   ;;  %712 = vmatprep.mubr.bf16.mxu1 %v1189_v35 }
   0xb   :  { %v1178_v26 = vld [vmem:[%s1612_s1 + $0x30] sm:$0xff]   ;;  %v1182_v30 = vld [vmem:[%s1612_s1 + $0x38] sm:$0xff]   ;;  %v1191_v37 = vld [vmem:[%s1613_s0 + $0x2c] ss:$20 sps:$4 sm:$0xff]  }
   0xc   :  { %985 = vmatpush3.bf16.msra.mxu0 %v1162_v10  ;;  %v1179_v27 = vld [vmem:[%s1612_s1 + $0xb0] sm:$0xff]   ;;  %v1183_v31 = vld [vmem:[%s1612_s1 + $0xb8] sm:$0xff]   ;;  %v1203_v42 = vld [vmem:[%s1612_s1 + $0x108] sm:$0xff]  }
   0xd   :  { %1049 = vmatpush3.bf16.msra.mxu1 %v1163_v11  ;;  %986 = vmatprep.subr.bf16.mxu0 %v1164_v12  ;;  %v1184_v32 = vld [vmem:[%s1613_s0] ss:$20 sps:$4 sm:$0xff]   ;;  %v1186_v33 = vld [vmem:[%s1613_s0 + $0x4] ss:$20 sps:$4 sm:$0xff]   ;;  %v1187_v34 = vld [vmem:[%s1613_s0 + $0x8] ss:$20 sps:$4 sm:$0xff]  }
   0xe   :  { %1050 = vmatprep.subr.bf16.mxu1 %v1165_v13  ;;  %615 = vmatprep.mubr.bf16.mxu0 %v1186_v33  ;;  %v1193_v38 = vld [vmem:[%s1613_s0 + $0x34] ss:$20 sps:$4 sm:$0xff]   ;;  %v1196_v40 = vld [vmem:[%s1613_s0 + $0x30] ss:$20 sps:$4 sm:$0xff]   ;;  %v1202_v45 = vld [vmem:[%s1613_s0 + $0x58] ss:$20 sps:$4 sm:$0xff]  }
   0xf   :  { %v1195_v39 = vld [vmem:[%s1613_s0 + $0x28] ss:$20 sps:$4 sm:$0xff]   ;;  %v1201_v44 = vld [vmem:[%s1613_s0 + $0x50] ss:$20 sps:$4 sm:$0xff]   ;;  %v1208_v50 = vld [vmem:[%s1613_s0 + $0x78] ss:$20 sps:$4 sm:$0xff]  }
  0x10   :  { %987 = vmatpush3.bf16.msra.mxu0 %v1166_v14  ;;  %v1197_v41 = vld [vmem:[%s1613_s0 + $0x54] ss:$20 sps:$4 sm:$0xff]   ;;  %v1199_v43 = vld [vmem:[%s1613_s0 + $0x5c] ss:$20 sps:$4 sm:$0xff]   ;;  %v1206_v48 = vld [vmem:[%s1613_s0 + $0x84] ss:$20 sps:$4 sm:$0xff]  }
  0x11   :  { %1051 = vmatpush3.bf16.msra.mxu1 %v1167_v15  ;;  %988 = vmatprep.subr.bf16.mxu0 %v1168_v16  ;;  %v1216_v46 = vld [vmem:[%s1612_s1 + $0x110] sm:$0xff]   ;;  %v1229_v49 = vld [vmem:[%s1612_s1 + $0x118] sm:$0xff]   ;;  %v1212_v53 = vld [vmem:[%s1613_s0 + $0xac] ss:$20 sps:$4 sm:$0xff]  }
  0x12   :  { %1052 = vmatprep.subr.bf16.mxu1 %v1169_v17  ;;  %v1204_v47 = vld [vmem:[%s1613_s0 + $0x7c] ss:$20 sps:$4 sm:$0xff]   ;;  %v1209_v51 = vld [vmem:[%s1613_s0 + $0x80] ss:$20 sps:$4 sm:$0xff]   ;;  %v1210_v52 = vld [vmem:[%s1613_s0 + $0xa4] ss:$20 sps:$4 sm:$0xff]  }
  0x13   :  { %v1214_v54 = vld [vmem:[%s1613_s0 + $0xa0] ss:$20 sps:$4 sm:$0xff]   ;;  %v1215_v55 = vld [vmem:[%s1613_s0 + $0xa8] ss:$20 sps:$4 sm:$0xff]   ;;  %v1222_v59 = vld [vmem:[%s1613_s0 + $0xd0] ss:$20 sps:$4 sm:$0xff]  }
  0x14   :  { %989 = vmatpush3.bf16.msra.mxu0 %v1170_v18  ;;  %v1217_v56 = vld [vmem:[%s1613_s0 + $0xcc] ss:$20 sps:$4 sm:$0xff]   ;;  %v1219_v57 = vld [vmem:[%s1613_s0 + $0xd4] ss:$20 sps:$4 sm:$0xff]   ;;  %v1225_v61 = vld [vmem:[%s1613_s0 + $0xfc] ss:$20 sps:$4 sm:$0xff]  }
  0x15   :  { %1053 = vmatpush3.bf16.msra.mxu1 %v1171_v19  ;;  %990 = vmatprep.subr.bf16.mxu0 %v1172_v20  ;;  %v1221_v58 = vld [vmem:[%s1613_s0 + $0xc8] ss:$20 sps:$4 sm:$0xff]   ;;  %v1227_v62 = vld [vmem:[%s1613_s0 + $0xf0] ss:$20 sps:$4 sm:$0xff]   ;;  %v1228_v63 = vld [vmem:[%s1613_s0 + $0xf8] ss:$20 sps:$4 sm:$0xff]  }
  0x16   :  { %1054 = vmatprep.subr.bf16.mxu1 %v1173_v21  ;;  %v1223_v60 = vld [vmem:[%s1613_s0 + $0xf4] ss:$20 sps:$4 sm:$0xff]   ;;  %v1230_v0 = vld [vmem:[%s1613_s0 + $0x11c] ss:$20 sps:$4 sm:$0xff]   ;;  %v1232_v1 = vld [vmem:[%s1613_s0 + $0x124] ss:$20 sps:$4 sm:$0xff]  }
  0x17   :  { %v1234_v2 = vld [vmem:[%s1613_s0 + $0x118] ss:$20 sps:$4 sm:$0xff]   ;;  %v1235_v3 = vld [vmem:[%s1613_s0 + $0x120] ss:$20 sps:$4 sm:$0xff]   ;;  %v1236_v4 = vld [vmem:[%s1613_s0 + $0x10] ss:$20 sps:$4 sm:$0xff]  }
  0x18   :  { %991 = vmatpush3.bf16.msra.mxu0 %v1174_v22  ;;  %v1237_v5 = vld [vmem:[%s1613_s0 + $0xb0] ss:$20 sps:$4 sm:$0xff]   ;;  %v1238_v6 = vld [vmem:[%s1613_s0 + $0x38] ss:$20 sps:$4 sm:$0xff]   ;;  %v1240_v8 = vld [vmem:[%s1613_s0 + $0x60] ss:$20 sps:$4 sm:$0xff]  }
  0x19   :  { %1055 = vmatpush3.bf16.msra.mxu1 %v1175_v23  ;;  %992 = vmatprep.subr.bf16.mxu0 %v1176_v24  ;;  %v1239_v7 = vld [vmem:[%s1613_s0 + $0xd8] ss:$20 sps:$4 sm:$0xff]   ;;  %v1241_v9 = vld [vmem:[%s1613_s0 + $0x100] ss:$20 sps:$4 sm:$0xff]   ;;  %v1242_v10 = vld [vmem:[%s1613_s0 + $0x88] ss:$20 sps:$4 sm:$0xff]  }
  0x1a   :  { %1056 = vmatprep.subr.bf16.mxu1 %v1177_v25  ;;  %v1243_v11 = vld [vmem:[%s1613_s0 + $0x128] ss:$20 sps:$4 sm:$0xff]   ;;  %v1503_v14 = vld [vmem:[%s1614_s2] ss:$0 sm:$0xff] }
  0x1c   :  { %993 = vmatpush3.bf16.msra.mxu0 %v1178_v26 }
  0x1d   :  { %1057 = vmatpush3.bf16.msra.mxu1 %v1179_v27  ;;  %994 = vmatprep.subr.bf16.mxu0 %v1180_v28 }
  0x1e   :  { %1058 = vmatprep.subr.bf16.mxu1 %v1181_v29 }
  0x20   :  { %995 = vmatpush3.bf16.msra.mxu0 %v1182_v30 }
  0x21   :  { %1059 = vmatpush3.bf16.msra.mxu1 %v1183_v31  ;;  %1120 = vmatprep.subr.bf16.mxu0 %v1190_v36 }
  0x22   :  { %1144 = vmatprep.subr.bf16.mxu1 %v1190_v36 }
  0x23   :  { %616 = vmatmul.mubr.bf16.vlgmr.msra.gmra.mrb[0].mxu0 %v1184_v32 }
  0x24   :  { %713 = vmatmul.mubr.bf16.vlgmr.msra.gmra.mrb[0].mxu1 %v1187_v34  ;;  %1121 = vmatpush3.bf16.msra.mxu0 %v1190_v36 }
  0x25   :  { %1148 = vmatpush3.bf16.msra.mxu1 %v1190_v36  ;;  %623 = vmatprep.mubr.bf16.mxu0 %v1191_v37 }
  0x26   :  { %720 = vmatprep.mubr.bf16.mxu1 %v1193_v38  ;;  %1122 = vmatprep.subr.bf16.mxu0 %v1203_v42 }
  0x27   :  { %1145 = vmatprep.subr.bf16.mxu1 %v1203_v42 }
  0x28   :  { %1123 = vmatpush3.bf16.msra.mxu0 %v1203_v42 }
  0x29   :  { %1149 = vmatpush3.bf16.msra.mxu1 %v1203_v42  ;;  %1124 = vmatprep.subr.bf16.mxu0 %v1216_v46 }
  0x2a   :  { %1146 = vmatprep.subr.bf16.mxu1 %v1216_v46 }
  0x2b   :  { %624 = vmatmul.mubr.bf16.gmra.mrb[4].mxu0 %v1195_v39 }
  0x2c   :  { %721 = vmatmul.mubr.bf16.gmra.mrb[4].mxu1 %v1196_v40  ;;  %631 = vmatprep.mubr.bf16.mxu0 %v1197_v41 }
  0x2d   :  { %728 = vmatprep.mubr.bf16.mxu1 %v1199_v43  ;;  %1125 = vmatpush3.bf16.msra.mxu0 %v1216_v46 }
  0x2e   :  { %1150 = vmatpush3.bf16.msra.mxu1 %v1216_v46  ;;  %1126 = vmatprep.subr.bf16.mxu0 %v1229_v49 }
  0x2f   :  { %1147 = vmatprep.subr.bf16.mxu1 %v1229_v49 }
  0x31   :  { %1127 = vmatpush3.bf16.msra.mxu0 %v1229_v49 }
  0x32   :  { %1151 = vmatpush3.bf16.msra.mxu1 %v1229_v49 }
  0x33   :  { %632 = vmatmul.mubr.bf16.gmra.mrb[8].mxu0 %v1201_v44 }
  0x34   :  { %729 = vmatmul.mubr.bf16.gmra.mrb[8].mxu1 %v1202_v45  ;;  %639 = vmatprep.mubr.bf16.mxu0 %v1204_v47 }
  0x35   :  { %736 = vmatprep.mubr.bf16.mxu1 %v1206_v48 }
  0x3b   :  { %640 = vmatmul.mubr.bf16.gmra.mrb[12].mxu0 %v1208_v50 }
  0x3c   :  { %737 = vmatmul.mubr.bf16.gmra.mrb[12].mxu1 %v1209_v51  ;;  %647 = vmatprep.mubr.bf16.mxu0 %v1210_v52 }
  0x3d   :  { %744 = vmatprep.mubr.bf16.mxu1 %v1212_v53 }
  0x43   :  { %648 = vmatmul.mubr.bf16.gmra.mrb[16].mxu0 %v1214_v54 }
  0x44   :  { %745 = vmatmul.mubr.bf16.gmra.mrb[16].mxu1 %v1215_v55  ;;  %655 = vmatprep.mubr.bf16.mxu0 %v1217_v56 }
  0x45   :  { %752 = vmatprep.mubr.bf16.mxu1 %v1219_v57 }
  0x4b   :  { %656 = vmatmul.mubr.bf16.gmra.mrb[20].mxu0 %v1221_v58 }
  0x4c   :  { %753 = vmatmul.mubr.bf16.gmra.mrb[20].mxu1 %v1222_v59  ;;  %663 = vmatprep.mubr.bf16.mxu0 %v1223_v60 }
  0x4d   :  { %760 = vmatprep.mubr.bf16.mxu1 %v1225_v61 }
  0x53   :  { %664 = vmatmul.mubr.bf16.gmra.mrb[24].mxu0 %v1227_v62 }
  0x54   :  { %761 = vmatmul.mubr.bf16.gmra.mrb[24].mxu1 %v1228_v63  ;;  %671 = vmatprep.mubr.bf16.mxu0 %v1230_v0 }
  0x55   :  { %768 = vmatprep.mubr.bf16.mxu1 %v1232_v1 }
  0x5b   :  { %672 = vmatmul.mubr.bf16.gmra.mrb[28].mxu0 %v1234_v2 }
  0x5c   :  { %769 = vmatmul.mubr.bf16.gmra.mrb[28].mxu1 %v1235_v3  ;;  %1128 = vmatprep.mubr.msk.bf16.mxu0 %vm558_vm0, %v1236_v4 }
  0x5d   :  { %1136 = vmatprep.mubr.msk.bf16.mxu1 %vm558_vm0, %v1237_v5 }
  0x63   :  { %1129 = vmatmul.mubr.msk.bf16.vlgmr.msra.gmra.mrb[32].mxu0 %vm558_vm0, %v1238_v6 }
  0x64   :  { %1137 = vmatmul.mubr.msk.bf16.vlgmr.msra.gmra.mrb[32].mxu1 %vm558_vm0, %v1239_v7  ;;  %1132 = vmatprep.mubr.msk.bf16.mxu0 %vm558_vm0, %v1240_v8 }
  0x65   :  { %1140 = vmatprep.mubr.msk.bf16.mxu1 %vm558_vm0, %v1241_v9 }
  0x6b   :  { %1133 = vmatmul.mubr.msk.bf16.gmra.mrb[36].mxu0 %vm558_vm0, %v1242_v10 }
  0x6c   :  { %1141 = vmatmul.mubr.msk.bf16.gmra.mrb[36].mxu1 %vm558_vm0, %v1243_v11 }
  0xf6   :  { %v996_v12 = vpop.f32.mrb[0].mxu0 }
  0xf7   :  { %v1060_v13 = vpop.f32.mrb[0].mxu1  ;;  %v997_v15 = vpop.f32.mrb[1].mxu0 }
  0xf8   :  { %v998_v16 = vadd.f32 %v997_v15, %v996_v12  ;;  %v1061_v17 = vpop.f32.mrb[1].mxu1  ;;  %v999_v18 = vpop.f32.mrb[2].mxu0 }
  0xf9   :  { %v1062_v19 = vadd.f32 %v1061_v17, %v1060_v13  ;;  %v1063_v20 = vpop.f32.mrb[2].mxu1  ;;  %v1000_v21 = vpop.f32.mrb[3].mxu0 }
  0xfa   :  { %v618_v22 = vadd.f32 %v998_v16, %v1503_v14  ;;  %v1001_v23 = vadd.f32 %v1000_v21, %v999_v18  ;;  %v1064_v24 = vpop.f32.mrb[3].mxu1 }
  0xfb   :  { %v1065_v25 = vadd.f32 %v1064_v24, %v1063_v20 }
  0xfc   :  { %v621_v26 = vadd.f32 %v1001_v23, %v1503_v14  ;;  %v1507_v27 = vadd.f32 %v1062_v19, %v618_v22 }
  0xfe   :  { %v1002_v28 = vpop.f32.mrb[4].mxu0  ;;  %v1509_v29 = vadd.f32 %v1065_v25, %v621_v26 }
  0xff   :  { %v1066_v30 = vpop.f32.mrb[4].mxu1  ;;  %v1003_v31 = vpop.f32.mrb[5].mxu0 }
 0x100   :  { %v1004_v32 = vadd.f32 %v1003_v31, %v1002_v28  ;;  %v1067_v33 = vpop.f32.mrb[5].mxu1  ;;  %v1005_v34 = vpop.f32.mrb[6].mxu0 }
 0x101   :  { %v1068_v35 = vadd.f32 %v1067_v33, %v1066_v30  ;;  %v1069_v36 = vpop.f32.mrb[6].mxu1  ;;  %v1006_v37 = vpop.f32.mrb[7].mxu0 }
 0x102   :  { %v626_v38 = vadd.f32 %v1004_v32, %v1503_v14  ;;  %v1007_v39 = vadd.f32 %v1006_v37, %v1005_v34  ;;  %v1070_v40 = vpop.f32.mrb[7].mxu1 }
 0x103   :  { %v1071_v41 = vadd.f32 %v1070_v40, %v1069_v36 }
 0x104   :  { %v629_v42 = vadd.f32 %v1007_v39, %v1503_v14  ;;  %v1513_v43 = vadd.f32 %v1068_v35, %v626_v38 }
 0x106   :  { %v1008_v44 = vpop.f32.mrb[8].mxu0  ;;  %v1515_v45 = vadd.f32 %v1071_v41, %v629_v42 }
 0x107   :  { %v1072_v46 = vpop.f32.mrb[8].mxu1  ;;  %v1009_v47 = vpop.f32.mrb[9].mxu0 }
 0x108   :  { %v1010_v48 = vadd.f32 %v1009_v47, %v1008_v44  ;;  %v1073_v49 = vpop.f32.mrb[9].mxu1  ;;  %v1011_v50 = vpop.f32.mrb[10].mxu0 }
 0x109   :  { %v1074_v51 = vadd.f32 %v1073_v49, %v1072_v46  ;;  %v1075_v52 = vpop.f32.mrb[10].mxu1  ;;  %v1012_v53 = vpop.f32.mrb[11].mxu0 }
 0x10a   :  { %v634_v54 = vadd.f32 %v1010_v48, %v1503_v14  ;;  %v1013_v55 = vadd.f32 %v1012_v53, %v1011_v50  ;;  %v1076_v56 = vpop.f32.mrb[11].mxu1 }
 0x10b   :  { %v1077_v57 = vadd.f32 %v1076_v56, %v1075_v52 }
 0x10c   :  { %v637_v58 = vadd.f32 %v1013_v55, %v1503_v14  ;;  %v1519_v59 = vadd.f32 %v1074_v51, %v634_v54 }
 0x10e   :  { %v1014_v60 = vpop.f32.mrb[12].mxu0  ;;  %v1521_v61 = vadd.f32 %v1077_v57, %v637_v58 }
 0x10f   :  { %v1078_v62 = vpop.f32.mrb[12].mxu1  ;;  %v1015_v63 = vpop.f32.mrb[13].mxu0 }
 0x110   :  { %v1016_v0 = vadd.f32 %v1015_v63, %v1014_v60  ;;  %v1079_v1 = vpop.f32.mrb[13].mxu1  ;;  %v1017_v2 = vpop.f32.mrb[14].mxu0 }
 0x111   :  { %v1080_v3 = vadd.f32 %v1079_v1, %v1078_v62  ;;  %v1081_v4 = vpop.f32.mrb[14].mxu1  ;;  %v1018_v5 = vpop.f32.mrb[15].mxu0 }
 0x112   :  { %v642_v6 = vadd.f32 %v1016_v0, %v1503_v14  ;;  %v1019_v7 = vadd.f32 %v1018_v5, %v1017_v2  ;;  %v1082_v8 = vpop.f32.mrb[15].mxu1 }
 0x113   :  { %v1083_v9 = vadd.f32 %v1082_v8, %v1081_v4 }
 0x114   :  { %v645_v10 = vadd.f32 %v1019_v7, %v1503_v14  ;;  %v1525_v11 = vadd.f32 %v1080_v3, %v642_v6 }
 0x116   :  { %v1020_v12 = vpop.f32.mrb[16].mxu0  ;;  %v1527_v13 = vadd.f32 %v1083_v9, %v645_v10 }
 0x117   :  { %v1084_v15 = vpop.f32.mrb[16].mxu1  ;;  %v1021_v16 = vpop.f32.mrb[17].mxu0 }
 0x118   :  { %v1022_v17 = vadd.f32 %v1021_v16, %v1020_v12  ;;  %v1085_v18 = vpop.f32.mrb[17].mxu1  ;;  %v1023_v19 = vpop.f32.mrb[18].mxu0 }
 0x119   :  { %v1086_v20 = vadd.f32 %v1085_v18, %v1084_v15  ;;  %v1087_v21 = vpop.f32.mrb[18].mxu1  ;;  %v1024_v22 = vpop.f32.mrb[19].mxu0 }
 0x11a   :  { %v650_v23 = vadd.f32 %v1022_v17, %v1503_v14  ;;  %v1025_v24 = vadd.f32 %v1024_v22, %v1023_v19  ;;  %v1088_v25 = vpop.f32.mrb[19].mxu1 }
 0x11b   :  { %v1089_v26 = vadd.f32 %v1088_v25, %v1087_v21 }
 0x11c   :  { %v653_v28 = vadd.f32 %v1025_v24, %v1503_v14  ;;  %v747_v30 = vadd.f32 %v1086_v20, %v650_v23 }
 0x11e   :  { %v1026_v31 = vpop.f32.mrb[20].mxu0  ;;  %v1531_v32 = vadd.f32 %v1089_v26, %v653_v28 }
 0x11f   :  { %v1090_v33 = vpop.f32.mrb[20].mxu1  ;;  %v1027_v34 = vpop.f32.mrb[21].mxu0 }
 0x120   :  { %v1028_v35 = vadd.f32 %v1027_v34, %v1026_v31  ;;  %v1091_v36 = vpop.f32.mrb[21].mxu1  ;;  %v1029_v37 = vpop.f32.mrb[22].mxu0 }
 0x121   :  { %v1092_v38 = vadd.f32 %v1091_v36, %v1090_v33  ;;  %v1093_v39 = vpop.f32.mrb[22].mxu1  ;;  %v1030_v40 = vpop.f32.mrb[23].mxu0 }
 0x122   :  { %v658_v41 = vadd.f32 %v1028_v35, %v1503_v14  ;;  %v1031_v42 = vadd.f32 %v1030_v40, %v1029_v37  ;;  %v1094_v44 = vpop.f32.mrb[23].mxu1 }
 0x123   :  { %v1095_v46 = vadd.f32 %v1094_v44, %v1093_v39 }
 0x124   :  { %v661_v47 = vadd.f32 %v1031_v42, %v1503_v14  ;;  %v755_v48 = vadd.f32 %v1092_v38, %v658_v41 }
 0x126   :  { %v1032_v49 = vpop.f32.mrb[24].mxu0  ;;  %v758_v50 = vadd.f32 %v1095_v46, %v661_v47 }
 0x127   :  { %v1096_v51 = vpop.f32.mrb[24].mxu1  ;;  %v1033_v52 = vpop.f32.mrb[25].mxu0 }
 0x128   :  { %v1034_v53 = vadd.f32 %v1033_v52, %v1032_v49  ;;  %v1097_v54 = vpop.f32.mrb[25].mxu1  ;;  %v1035_v55 = vpop.f32.mrb[26].mxu0 }
 0x129   :  { %v1098_v56 = vadd.f32 %v1097_v54, %v1096_v51  ;;  %v1099_v57 = vpop.f32.mrb[26].mxu1  ;;  %v1036_v58 = vpop.f32.mrb[27].mxu0 }
 0x12a   :  { %v666_v60 = vadd.f32 %v1034_v53, %v1503_v14  ;;  %v1037_v62 = vadd.f32 %v1036_v58, %v1035_v55  ;;  %v1100_v63 = vpop.f32.mrb[27].mxu1 }
 0x12b   :  { %v1101_v0 = vadd.f32 %v1100_v63, %v1099_v57 }
 0x12c   :  { %v669_v1 = vadd.f32 %v1037_v62, %v1503_v14  ;;  %v763_v2 = vadd.f32 %v1098_v56, %v666_v60 }
 0x12e   :  { %v1038_v3 = vpop.f32.mrb[28].mxu0  ;;  %v766_v4 = vadd.f32 %v1101_v0, %v669_v1 }
 0x12f   :  { %v1102_v5 = vpop.f32.mrb[28].mxu1  ;;  %v1039_v6 = vpop.f32.mrb[29].mxu0 }
 0x130   :  { %v1040_v7 = vadd.f32 %v1039_v6, %v1038_v3  ;;  %v1103_v8 = vpop.f32.mrb[29].mxu1  ;;  %v1041_v9 = vpop.f32.mrb[30].mxu0 }
 0x131   :  { %v1104_v10 = vadd.f32 %v1103_v8, %v1102_v5  ;;  %v1105_v12 = vpop.f32.mrb[30].mxu1  ;;  %v1042_v15 = vpop.f32.mrb[31].mxu0 }
 0x132   :  { %v674_v16 = vadd.f32 %v1040_v7, %v1503_v14  ;;  %v1043_v17 = vadd.f32 %v1042_v15, %v1041_v9  ;;  %v1106_v18 = vpop.f32.mrb[31].mxu1 }
 0x133   :  { %v1107_v19 = vadd.f32 %v1106_v18, %v1105_v12 }
 0x134   :  { %v677_v20 = vadd.f32 %v1043_v17, %v1503_v14  ;;  %v771_v21 = vadd.f32 %v1104_v10, %v674_v16 }
 0x136   :  { %v1130_v22 = vpop.f32.mrb[32].mxu0  ;;  %v774_v23 = vadd.f32 %v1107_v19, %v677_v20 }
 0x137   :  { %v820_v24 = vadd.f32 %v1130_v22, %v1513_v43  ;;  %v1138_v25 = vpop.f32.mrb[32].mxu1  ;;  %v811_v26 = vpop.f32.mrb[33].mxu0 }
 0x138   :  { %v852_v28 = vadd.f32 %v1138_v25, %v755_v48  ;;  %v812_v31 = vadd.f32 %v811_v26, %v1507_v27  ;;  %v843_v33 = vpop.f32.mrb[33].mxu1  ;;  %v1131_v34 = vpop.f32.mrb[34].mxu0 }
 0x139   :  { %877 = vst.msk [vmem:[%s1615_s3 + $0x10] sm:$0xff] %vm874_vm1, %v820_v24  ;;  %v844_v35 = vadd.f32 %v843_v33, %v747_v30  ;;  %v823_v14 = vadd.f32 %v1131_v34, %v1515_v45  ;;  %v1139_v36 = vpop.f32.mrb[34].mxu1  ;;  %v814_v37 = vpop.f32.mrb[35].mxu0 }
 0x13a   :  { %885 = vst.msk [vmem:[%s1615_s3 + $0x50] sm:$0xff] %vm874_vm1, %v852_v28  ;;  %875 = vst.msk [vmem:[%s1615_s3] sm:$0xff] %vm874_vm1, %v812_v31  ;;  %v855_v27 = vadd.f32 %v1139_v36, %v758_v50  ;;  %v815_v43 = vadd.f32 %v814_v37, %v1509_v29  ;;  %v846_v38 = vpop.f32.mrb[35].mxu1 }
 0x13b   :  { %883 = vst.msk [vmem:[%s1615_s3 + $0x40] sm:$0xff] %vm874_vm1, %v844_v35  ;;  %878 = vst.msk [vmem:[%s1615_s3 + $0x18] sm:$0xff] %vm874_vm1, %v823_v14  ;;  %v847_v45 = vadd.f32 %v846_v38, %v1531_v32 }
 0x13c   :  { %886 = vst.msk [vmem:[%s1615_s3 + $0x58] sm:$0xff] %vm874_vm1, %v855_v27  ;;  %876 = vst.msk [vmem:[%s1615_s3 + $0x8] sm:$0xff] %vm874_vm1, %v815_v43 }
 0x13d   :  { %884 = vst.msk [vmem:[%s1615_s3 + $0x48] sm:$0xff] %vm874_vm1, %v847_v45 }
 0x13e   :  { %v1134_v29 = vpop.f32.mrb[36].mxu0 }
 0x13f   :  { %v836_v30 = vadd.f32 %v1134_v29, %v1525_v11  ;;  %v1142_v39 = vpop.f32.mrb[36].mxu1  ;;  %v827_v32 = vpop.f32.mrb[37].mxu0 }
 0x140   :  { %v868_v40 = vadd.f32 %v1142_v39, %v771_v21  ;;  %v828_v41 = vadd.f32 %v827_v32, %v1519_v59  ;;  %v859_v42 = vpop.f32.mrb[37].mxu1  ;;  %v1135_v44 = vpop.f32.mrb[38].mxu0 }
 0x141   :  { %881 = vst.msk [vmem:[%s1615_s3 + $0x30] sm:$0xff] %vm874_vm1, %v836_v30  ;;  %v860_v46 = vadd.f32 %v859_v42, %v763_v2  ;;  %v839_v47 = vadd.f32 %v1135_v44, %v1527_v13  ;;  %v1143_v48 = vpop.f32.mrb[38].mxu1  ;;  %v830_v49 = vpop.f32.mrb[39].mxu0 }
 0x142   :  { %889 = vst.msk [vmem:[%s1615_s3 + $0x70] sm:$0xff] %vm874_vm1, %v868_v40  ;;  %879 = vst.msk [vmem:[%s1615_s3 + $0x20] sm:$0xff] %vm874_vm1, %v828_v41  ;;  %v871_v59 = vadd.f32 %v1143_v48, %v774_v23  ;;  %v831_v11 = vadd.f32 %v830_v49, %v1521_v61  ;;  %v862_v50 = vpop.f32.mrb[39].mxu1 }
 0x143   :  { %887 = vst.msk [vmem:[%s1615_s3 + $0x60] sm:$0xff] %vm874_vm1, %v860_v46  ;;  %882 = vst.msk [vmem:[%s1615_s3 + $0x38] sm:$0xff] %vm874_vm1, %v839_v47  ;;  %v863_v13 = vadd.f32 %v862_v50, %v766_v4 }
 0x144   :  { %890 = vst.msk [vmem:[%s1615_s3 + $0x78] sm:$0xff] %vm874_vm1, %v871_v59  ;;  %880 = vst.msk [vmem:[%s1615_s3 + $0x28] sm:$0xff] %vm874_vm1, %v831_v11 }
 0x145   :  { %888 = vst.msk [vmem:[%s1615_s3 + $0x68] sm:$0xff] %vm874_vm1, %v863_v13 }

// kernel: tile.13
= control target key start
LH: loop header
LB: loop body
LE: loop exit
PB: predicated region body
PF: predicated region fallthrough
CT: control target
= control target key end

     0   :  { %s22_s0 = inlined_call_operand.vmem [shape: f32[32], index: 0, kind: input, shape index: {}]   ;;  %s23_s1 = inlined_call_operand.vmem [shape: f32[4,32], index: 1, kind: output, shape index: {}]  }
   0x1   :  { %v4_v0 = vld [vmem:[%s22_s0] ss:$0 sm:$0xff] }
   0x2   :  { %5 = vst [vmem:[%s23_s1] sm:$0xf] %v4_v0 }

// kernel: tile.14
= control target key start
LH: loop header
LB: loop body
LE: loop exit
PB: predicated region body
PF: predicated region fallthrough
CT: control target
= control target key end

     0   :  { %vm7_vm0 = vcmask 261120   ;;  %s37_s8 = smov 32   ;;  %s38_s9 = smov 64   ;;  %vm13_vm1 = vcmask 1048320   ;;  %vm19_vm2 = vcmask 785920   ;;  %vm25_vm3 = vcmask 523520   ;;  %s55_s0 = inlined_call_operand.vmem [shape: f32[4,32], index: 0, kind: input, shape index: {}]   ;;  %s56_s1 = inlined_call_operand.vmem [shape: f32[1,128], index: 1, kind: output, shape index: {}]  }
   0x1   :  { %v4_v0 = vld [vmem:[%s55_s0] sm:$0xf]  ;;  %s36_s0 = smov 96  }
   0x2   :  { %5 = vst [vmem:[#allocation1] sm:$0xf] %v4_v0 }
   0x9   :  { %v10_v1 = vld [vmem:[#allocation1 + $0x3] sm:$0x1]   ;;  %v22_v2 = vld [vmem:[#allocation1 + $0x1] sm:$0x1]   ;;  %v6_v3 = vld [vmem:[#allocation1] sm:$0x1]  }
   0xa   :  { %11 = vrot.lane.b32.xlu0 %v10_v1, %s36_s0  ;;  %23 = vrot.lane.b32.xlu1 %v22_v2, %s37_s8  ;;  %v16_v4 = vld [vmem:[#allocation1 + $0x2] sm:$0x1]   ;;  %8 = vst.msk [vmem:[#allocation0] sm:$0x1] %vm7_vm0, %v6_v3  }
   0xe   :  { %17 = vrot.lane.b32.xlu0 %v16_v4, %s38_s9 }
  0x7c   :  { %v12_v5 = vpop.permute.xlu0 %11   ;;  %v24_v6 = vpop.permute.xlu1 %23  }
  0x7d   :  { %14 = vst.msk [vmem:[#allocation0] sm:$0x1] %vm13_vm1, %v12_v5  }
  0x80   :  { %v18_v7 = vpop.permute.xlu0 %17  }
  0x81   :  { %20 = vst.msk [vmem:[#allocation0] sm:$0x1] %vm19_vm2, %v18_v7  }
  0x82   :  { %26 = vst.msk [vmem:[#allocation0] sm:$0x1] %vm25_vm3, %v24_v6  }
  0x89   :  { %v30_v8 = vld [vmem:[#allocation0] sm:$0x1] }
  0x8a   :  { %32 = vst [vmem:[%s56_s1] sm:$0x1] %v30_v8 }

// kernel: cnn_forward.7
= control target key start
LH: loop header
LB: loop body
LE: loop exit
PB: predicated region body
PF: predicated region fallthrough
CT: control target
= control target key end

     0   :  { %vm204_vm0 = vcmask 261120   ;;  %vm309_vm1 = vcmask 130048   ;;  %s522_s1 = inlined_call_operand.vmem [shape: bf16[288,16], index: 1, kind: input, shape index: {}]   ;;  %s523_s0 = inlined_call_operand.vmem [shape: bf16[32,288], index: 0, kind: input, shape index: {}]   ;;  %s524_s2 = inlined_call_operand.vmem [shape: f32[1,16], index: 2, kind: input, shape index: {}]   ;;  %s525_s3 = inlined_call_operand.vmem [shape: f32[32,16], index: 3, kind: output, shape index: {}]  }
   0x1   :  { %v385_v0 = vld [vmem:[%s522_s1 + $0x40] sm:$0xff]   ;;  %v387_v2 = vld [vmem:[%s522_s1 + $0x48] sm:$0xff]   ;;  %v389_v4 = vld [vmem:[%s522_s1 + $0x50] sm:$0xff]  }
   0x2   :  { %v386_v1 = vld [vmem:[%s522_s1] sm:$0xff]   ;;  %345 = vmatprep.subr.bf16.mxu0 %v385_v0  ;;  %v388_v3 = vld [vmem:[%s522_s1 + $0x8] sm:$0xff]   ;;  %v390_v5 = vld [vmem:[%s522_s1 + $0x10] sm:$0xff]  }
   0x3   :  { %346 = vmatpush3.bf16.msra.mxu0 %v386_v1  ;;  %v391_v6 = vld [vmem:[%s522_s1 + $0x58] sm:$0xff]   ;;  %v393_v8 = vld [vmem:[%s522_s1 + $0x60] sm:$0xff]   ;;  %v395_v11 = vld [vmem:[%s522_s1 + $0x68] sm:$0xff]  }
   0x4   :  { %347 = vmatprep.subr.bf16.mxu0 %v387_v2  ;;  %v392_v7 = vld [vmem:[%s522_s1 + $0x18] sm:$0xff]   ;;  %v394_v9 = vld [vmem:[%s522_s1 + $0x20] sm:$0xff]   ;;  %v396_v12 = vld [vmem:[%s522_s1 + $0x28] sm:$0xff]  }
   0x5   :  { %v400_v10 = vld [vmem:[%s522_s1 + $0x80] sm:$0xff]   ;;  %v397_v13 = vld [vmem:[%s522_s1 + $0x70] sm:$0xff]   ;;  %v405_v15 = vld [vmem:[%s522_s1 + $0x88] sm:$0xff]  }
   0x6   :  { %377 = vmatprep.subr.bf16.mxu1 %v400_v10  ;;  %v404_v14 = vld [vmem:[%s523_s0 + $0x4] ss:$12 sps:$4 sm:$0xff]   ;;  %v406_v16 = vld [vmem:[%s523_s0 + $0x8] ss:$12 sps:$4 sm:$0xff]   ;;  %v407_v17 = vld [vmem:[%s523_s0 + $0x20] ss:$12 sps:$4 sm:$0xff]  }
   0x7   :  { %348 = vmatpush3.bf16.msra.mxu0 %v388_v3  ;;  %378 = vmatpush3.bf16.msra.mxu1 %v400_v10  ;;  %v398_v18 = vld [vmem:[%s522_s1 + $0x30] sm:$0xff]   ;;  %v399_v19 = vld [vmem:[%s522_s1 + $0x78] sm:$0xff]   ;;  %v402_v21 = vld [vmem:[%s523_s0] ss:$12 sps:$4 sm:$0xff]  }
   0x8   :  { %349 = vmatprep.subr.bf16.mxu0 %v389_v4  ;;  %243 = vmatprep.mubr.bf16.mxu0 %v404_v14  ;;  %v401_v20 = vld [vmem:[%s522_s1 + $0x38] sm:$0xff]   ;;  %v318_v30 = vld [vmem:[%s524_s2] ss:$0 sm:$0xff] }
   0x9   :  { %379 = vmatprep.subr.bf16.mxu1 %v405_v15  ;;  %381 = vmatprep.mubr.msk.bf16.mxu1 %vm204_vm0, %v406_v16  ;;  %v408_v22 = vld [vmem:[%s523_s0 + $0x1c] ss:$12 sps:$4 sm:$0xff]   ;;  %v410_v23 = vld [vmem:[%s523_s0 + $0x18] ss:$12 sps:$4 sm:$0xff]  }
   0xb   :  { %350 = vmatpush3.bf16.msra.mxu0 %v390_v5  ;;  %380 = vmatpush3.bf16.msra.mxu1 %v405_v15 }
   0xc   :  { %351 = vmatprep.subr.bf16.mxu0 %v391_v6 }
   0xe   :  { %382 = vmatmul.mubr.msk.bf16.vlgmr.msra.gmra.mrb[0].mxu1 %vm204_vm0, %v407_v17 }
   0xf   :  { %352 = vmatpush3.bf16.msra.mxu0 %v392_v7 }
  0x10   :  { %353 = vmatprep.subr.bf16.mxu0 %v393_v8 }
  0x13   :  { %354 = vmatpush3.bf16.msra.mxu0 %v394_v9 }
  0x14   :  { %355 = vmatprep.subr.bf16.mxu0 %v395_v11 }
  0x17   :  { %356 = vmatpush3.bf16.msra.mxu0 %v396_v12 }
  0x18   :  { %357 = vmatprep.subr.bf16.mxu0 %v397_v13 }
  0x1b   :  { %358 = vmatpush3.bf16.msra.mxu0 %v398_v18 }
  0x1c   :  { %359 = vmatprep.subr.bf16.mxu0 %v399_v19 }
  0x1f   :  { %360 = vmatpush3.bf16.msra.mxu0 %v401_v20 }
  0x22   :  { %244 = vmatmul.mubr.bf16.vlgmr.msra.gmra.mrb[0].mxu0 %v402_v21 }
  0x23   :  { %251 = vmatprep.mubr.bf16.mxu0 %v408_v22 }
  0x2a   :  { %252 = vmatmul.mubr.bf16.gmra.mrb[4].mxu0 %v410_v23 }
  0xe1   :  { %v383_v24 = vpop.f32.mrb[0].mxu1 }
  0xe2   :  { %v294_v25 = vpop.f32.mrb[1].mxu1 }
  0xe3   :  { %v384_v26 = vpop.f32.mrb[2].mxu1 }
  0xe4   :  { %v297_v27 = vpop.f32.mrb[3].mxu1 }
  0xf5   :  { %v361_v28 = vpop.f32.mrb[0].mxu0 }
  0xf6   :  { %v362_v29 = vpop.f32.mrb[1].mxu0 }
  0xf7   :  { %v363_v31 = vadd.f32 %v362_v29, %v361_v28  ;;  %v364_v32 = vpop.f32.mrb[2].mxu0 }
  0xf8   :  { %v365_v33 = vpop.f32.mrb[3].mxu0 }
  0xf9   :  { %v366_v34 = vadd.f32 %v365_v33, %v364_v32  ;;  %v246_v35 = vadd.f32 %v363_v31, %v318_v30 }
  0xfb   :  { %v295_v36 = vadd.f32 %v294_v25, %v246_v35  ;;  %v249_v37 = vadd.f32 %v366_v34, %v318_v30 }
  0xfd   :  { %310 = vst.msk [vmem:[%s525_s3] sm:$0xff] %vm309_vm1, %v295_v36  ;;  %v298_v38 = vadd.f32 %v297_v27, %v249_v37  ;;  %v367_v39 = vpop.f32.mrb[4].mxu0 }
  0xfe   :  { %v368_v40 = vpop.f32.mrb[5].mxu0 }
  0xff   :  { %311 = vst.msk [vmem:[%s525_s3 + $0x8] sm:$0xff] %vm309_vm1, %v298_v38  ;;  %v369_v41 = vadd.f32 %v368_v40, %v367_v39  ;;  %v370_v42 = vpop.f32.mrb[6].mxu0 }
 0x100   :  { %v371_v43 = vpop.f32.mrb[7].mxu0 }
 0x101   :  { %v254_v44 = vadd.f32 %v369_v41, %v318_v30  ;;  %v372_v45 = vadd.f32 %v371_v43, %v370_v42 }
 0x103   :  { %v303_v46 = vadd.f32 %v383_v24, %v254_v44  ;;  %v257_v47 = vadd.f32 %v372_v45, %v318_v30 }
 0x105   :  { %312 = vst.msk [vmem:[%s525_s3 + $0x10] sm:$0xff] %vm309_vm1, %v303_v46  ;;  %v306_v48 = vadd.f32 %v384_v26, %v257_v47 }
 0x107   :  { %313 = vst.msk [vmem:[%s525_s3 + $0x18] sm:$0xff] %vm309_vm1, %v306_v48 }

// kernel: cnn_forward.8
= control target key start
LH: loop header
LB: loop body
LE: loop exit
PB: predicated region body
PF: predicated region fallthrough
CT: control target
= control target key end

     0   :  { %vm68_vm0 = vcmask 523264   ;;  %s218_s1 = inlined_call_operand.vmem [shape: bf16[64,128], index: 1, kind: input, shape index: {}]   ;;  %s219_s0 = inlined_call_operand.vmem [shape: bf16[32,64], index: 0, kind: input, shape index: {}]   ;;  %s220_s2 = inlined_call_operand.vmem [shape: f32[1,128], index: 2, kind: input, shape index: {}]   ;;  %s221_s3 = inlined_call_operand.vmem [shape: f32[32,128], index: 3, kind: output, shape index: {}]  }
   0x1   :  { %v159_v0 = vld [vmem:[%s218_s1] sm:$0xff]   ;;  %v160_v1 = vld [vmem:[%s218_s1 + $0x8] sm:$0xff]   ;;  %v161_v2 = vld [vmem:[%s218_s1 + $0x10] sm:$0xff]  }
   0x2   :  { %147 = vmatprep.subr.bf16.mxu0 %v159_v0  ;;  %v163_v3 = vld [vmem:[%s219_s0] sm:$0xff]   ;;  %v162_v4 = vld [vmem:[%s218_s1 + $0x18] sm:$0xff]   ;;  %v164_v5 = vld [vmem:[%s219_s0 + $0x8] sm:$0xff]  }
   0x3   :  { %148 = vmatpush3.bf16.msra.mxu0 %v159_v0  ;;  %155 = vmatprep.mubr.msk.bf16.mxu0 %vm68_vm0, %v163_v3  ;;  %v132_v6 = vld [vmem:[%s220_s2] ss:$0 sm:$0xff] }
   0x4   :  { %149 = vmatprep.subr.bf16.mxu0 %v160_v1 }
   0x7   :  { %150 = vmatpush3.bf16.msra.mxu0 %v160_v1 }
   0x8   :  { %151 = vmatprep.subr.bf16.mxu0 %v161_v2 }
   0xb   :  { %152 = vmatpush3.bf16.msra.mxu0 %v161_v2 }
   0xc   :  { %153 = vmatprep.subr.bf16.mxu0 %v162_v4 }
   0xf   :  { %154 = vmatpush3.bf16.msra.mxu0 %v162_v4 }
  0x12   :  { %156 = vmatmul.mubr.msk.bf16.vlgmr.msra.gmra.mrb[0].mxu0 %vm68_vm0, %v164_v5 }
  0xe5   :  { %v157_v7 = vpop.f32.mrb[0].mxu0 }
  0xe6   :  { %v118_v8 = vadd.f32 %v157_v7, %v132_v6  ;;  %v109_v9 = vpop.f32.mrb[1].mxu0 }
  0xe7   :  { %v110_v10 = vadd.f32 %v132_v6, %v109_v9  ;;  %v158_v11 = vpop.f32.mrb[2].mxu0 }
  0xe8   :  { %126 = vst [vmem:[%s221_s3 + $0x10] sm:$0xff] %v118_v8  ;;  %v121_v12 = vadd.f32 %v158_v11, %v132_v6  ;;  %v112_v13 = vpop.f32.mrb[3].mxu0 }
  0xe9   :  { %124 = vst [vmem:[%s221_s3] sm:$0xff] %v110_v10  ;;  %v113_v14 = vadd.f32 %v132_v6, %v112_v13 }
  0xea   :  { %127 = vst [vmem:[%s221_s3 + $0x18] sm:$0xff] %v121_v12 }
  0xeb   :  { %125 = vst [vmem:[%s221_s3 + $0x8] sm:$0xff] %v113_v14 }

// kernel: tile.18
= control target key start
LH: loop header
LB: loop body
LE: loop exit
PB: predicated region body
PF: predicated region fallthrough
CT: control target
= control target key end

     0   :  { %s22_s0 = inlined_call_operand.vmem [shape: f32[64], index: 0, kind: input, shape index: {}]   ;;  %s23_s1 = inlined_call_operand.vmem [shape: f32[4,64], index: 1, kind: output, shape index: {}]  }
   0x1   :  { %v4_v0 = vld [vmem:[%s22_s0] ss:$0 sm:$0xff] }
   0x2   :  { %5 = vst [vmem:[%s23_s1] sm:$0xf] %v4_v0 }

// kernel: tile.19
= control target key start
LH: loop header
LB: loop body
LE: loop exit
PB: predicated region body
PF: predicated region fallthrough
CT: control target
= control target key end

     0   :  { %s6_s8 = smov 3  ;;  %vm8_vm0 = vcmask 523264   ;;  %s30_s9 = smov 64   ;;  %vm15_vm1 = vcmask 1048064   ;;  %s50_s0 = inlined_call_operand.vmem [shape: f32[4,64], index: 0, kind: input, shape index: {}]   ;;  %s51_s1 = inlined_call_operand.vmem [shape: f32[1,256], index: 1, kind: output, shape index: {}]  }
   0x1   :  { %v4_v0 = vld [vmem:[%s50_s0] sm:$0xf]  ;;  %s11_s0 = smov 3 }
   0x2   :  { %5 = vst [vmem:[#allocation1] sm:$0xf] %v4_v0 }
   0x9   :  { %v12_v1 = vld [vmem:[#allocation1 + $0x1] ss:$2 sm:%s11_s0]   ;;  %v7_v2 = vld [vmem:[#allocation1] ss:$2 sm:%s6_s8]  }
   0xa   :  { %13 = vrot.lane.b32.xlu0 %v12_v1, %s30_s9  ;;  %9 = vst.msk [vmem:[#allocation0] ss:$8 sm:$0x3] %vm8_vm0, %v7_v2  }
  0x7c   :  { %v14_v3 = vpop.permute.xlu0 %13  }
  0x7d   :  { %16 = vst.msk [vmem:[#allocation0] ss:$8 sm:$0x3] %vm15_vm1, %v14_v3  }
  0x84   :  { %v20_v4 = vld [vmem:[#allocation0] sm:$0x1]  ;;  %v24_v5 = vld [vmem:[#allocation0 + $0x8] sm:$0x1] }
  0x85   :  { %22 = vst [vmem:[%s51_s1] sm:$0x1] %v20_v4  ;;  %28 = vst [vmem:[%s51_s1 + $0x1] sm:$0x1] %v24_v5 }

// kernel: cnn_forward.9
= control target key start
LH: loop header
LB: loop body
LE: loop exit
PB: predicated region body
PF: predicated region fallthrough
CT: control target
= control target key end

     0   :  { %v409_v1 = vmov 0   ;;  %v49_v25 = vlaneseq  ;;  %s645_s1 = inlined_call_operand.vmem [shape: bf16[128,256], index: 1, kind: input, shape index: {}]   ;;  %s646_s0 = inlined_call_operand.vmem [shape: bf16[128,128], index: 0, kind: input, shape index: {}]   ;;  %s647_s2 = inlined_call_operand.vmem [shape: f32[1,256], index: 2, kind: input, shape index: {}]   ;;  %s648_s3 = inlined_call_operand.vmem [shape: f32[128,256], index: 3, kind: output, shape index: {}]  }
   0x1   :  { %v377_v0 = vld [vmem:[%s645_s1 + $0x4] ss:$8 sps:$4 sm:$0xff]   ;;  %219 = vmatprep.mubr.bf16.mxu0 %v409_v1  ;;  %259 = vmatprep.mubr.bf16.mxu1 %v409_v1  ;;  %v379_v2 = vld [vmem:[%s645_s1] ss:$8 sps:$4 sm:$0xff]   ;;  %v380_v3 = vld [vmem:[%s645_s1 + $0x14] ss:$8 sps:$4 sm:$0xff]  }
   0x2   :  { %187 = vmatprep.subr.bf16.mxu0 %v377_v0  ;;  %360 = vmatprep.subr.bf16.mxu1 %v377_v0  ;;  %v382_v4 = vld [vmem:[%s645_s1 + $0x10] ss:$8 sps:$4 sm:$0xff]   ;;  %v383_v5 = vld [vmem:[%s645_s1 + $0x24] ss:$8 sps:$4 sm:$0xff]   ;;  %v385_v6 = vld [vmem:[%s645_s1 + $0x20] ss:$8 sps:$4 sm:$0xff]  }
   0x3   :  { %188 = vmatpush1.bf16.msra.mxu0 %v379_v2  ;;  %368 = vmatpush1.bf16.msra.mxu1 %v379_v2  ;;  %v386_v7 = vld [vmem:[%s645_s1 + $0x34] ss:$8 sps:$4 sm:$0xff]   ;;  %v388_v8 = vld [vmem:[%s645_s1 + $0x30] ss:$8 sps:$4 sm:$0xff]   ;;  %v389_v9 = vld [vmem:[%s645_s1 + $0x44] ss:$8 sps:$4 sm:$0xff]  }
   0x4   :  { %189 = vmatprep.subr.bf16.mxu0 %v380_v3  ;;  %361 = vmatprep.subr.bf16.mxu1 %v380_v3  ;;  %v391_v10 = vld [vmem:[%s645_s1 + $0x40] ss:$8 sps:$4 sm:$0xff]   ;;  %v392_v11 = vld [vmem:[%s645_s1 + $0x54] ss:$8 sps:$4 sm:$0xff]   ;;  %v394_v12 = vld [vmem:[%s645_s1 + $0x50] ss:$8 sps:$4 sm:$0xff]  }
   0x5   :  { %v395_v13 = vld [vmem:[%s645_s1 + $0x64] ss:$8 sps:$4 sm:$0xff]   ;;  %v397_v14 = vld [vmem:[%s645_s1 + $0x60] ss:$8 sps:$4 sm:$0xff]   ;;  %v398_v15 = vld [vmem:[%s645_s1 + $0x74] ss:$8 sps:$4 sm:$0xff]  }
   0x6   :  { %v400_v16 = vld [vmem:[%s645_s1 + $0x70] ss:$8 sps:$4 sm:$0xff]   ;;  %v401_v17 = vld [vmem:[%s646_s0] sm:$0xff]   ;;  %v403_v19 = vld [vmem:[%s646_s0 + $0x8] sm:$0xff]   ;;  %v50_v26 = vshrl.u32 %v49_v25, 7 }
   0x7   :  { %190 = vmatpush1.bf16.msra.mxu0 %v382_v4  ;;  %369 = vmatpush1.bf16.msra.mxu1 %v382_v4  ;;  %v402_v18 = vld [vmem:[%s646_s0 + $0x20] sm:$0xff]   ;;  %v404_v20 = vld [vmem:[%s646_s0 + $0x28] sm:$0xff]   ;;  %v405_v21 = vld [vmem:[%s646_s0 + $0x10] sm:$0xff]  }
   0x8   :  { %191 = vmatprep.subr.bf16.mxu0 %v383_v5  ;;  %362 = vmatprep.subr.bf16.mxu1 %v383_v5  ;;  %v406_v22 = vld [vmem:[%s646_s0 + $0x30] sm:$0xff]   ;;  %v407_v23 = vld [vmem:[%s646_s0 + $0x18] sm:$0xff]   ;;  %v51_v27 = vsub.s32 0, %v50_v26  ;;  %v47_v28 = vld [vmem:[%s647_s2] sm:$0x3]  ;;  %v55_v29 = vsub.s32 1, %v50_v26 }
   0x9   :  { %v408_v24 = vld [vmem:[%s646_s0 + $0x38] sm:$0xff]  }
   0xa   :  { %v513_v30 = vrot.slane %v47_v28, %v51_v27  ;;  %v515_v31 = vrot.slane %v47_v28, %v55_v29 }
   0xb   :  { %192 = vmatpush1.bf16.msra.mxu0 %v385_v6  ;;  %370 = vmatpush1.bf16.msra.mxu1 %v385_v6 }
   0xc   :  { %193 = vmatprep.subr.bf16.mxu0 %v386_v7  ;;  %363 = vmatprep.subr.bf16.mxu1 %v386_v7 }
   0xf   :  { %194 = vmatpush1.bf16.msra.mxu0 %v388_v8  ;;  %371 = vmatpush1.bf16.msra.mxu1 %v388_v8 }
  0x10   :  { %195 = vmatprep.subr.bf16.mxu0 %v389_v9  ;;  %364 = vmatprep.subr.bf16.mxu1 %v389_v9 }
  0x13   :  { %196 = vmatpush1.bf16.msra.mxu0 %v391_v10  ;;  %372 = vmatpush1.bf16.msra.mxu1 %v391_v10 }
  0x14   :  { %197 = vmatprep.subr.bf16.mxu0 %v392_v11  ;;  %365 = vmatprep.subr.bf16.mxu1 %v392_v11 }
  0x17   :  { %198 = vmatpush1.bf16.msra.mxu0 %v394_v12  ;;  %373 = vmatpush1.bf16.msra.mxu1 %v394_v12 }
  0x18   :  { %199 = vmatprep.subr.bf16.mxu0 %v395_v13  ;;  %366 = vmatprep.subr.bf16.mxu1 %v395_v13 }
  0x1b   :  { %200 = vmatpush1.bf16.msra.mxu0 %v397_v14  ;;  %374 = vmatpush1.bf16.msra.mxu1 %v397_v14 }
  0x1c   :  { %201 = vmatprep.subr.bf16.mxu0 %v398_v15  ;;  %367 = vmatprep.subr.bf16.mxu1 %v398_v15 }
  0x1f   :  { %202 = vmatpush1.bf16.msra.mxu0 %v400_v16  ;;  %375 = vmatpush1.bf16.msra.mxu1 %v400_v16 }
  0x22   :  { %220 = vmatmul.mubr.bf16.vlgmr.msra.gmra.mrb[0].mxu0 %v401_v17  ;;  %260 = vmatmul.mubr.bf16.vlgmr.msra.gmra.mrb[0].mxu1 %v402_v18 }
  0x23   :  { %229 = vmatprep.mubr.bf16.mxu0 %v409_v1  ;;  %269 = vmatprep.mubr.bf16.mxu1 %v409_v1 }
  0x2a   :  { %230 = vmatmul.mubr.bf16.gmra.mrb[4].mxu0 %v403_v19  ;;  %270 = vmatmul.mubr.bf16.gmra.mrb[4].mxu1 %v404_v20 }
  0x2b   :  { %239 = vmatprep.mubr.bf16.mxu0 %v409_v1  ;;  %279 = vmatprep.mubr.bf16.mxu1 %v409_v1 }
  0x32   :  { %240 = vmatmul.mubr.bf16.gmra.mrb[8].mxu0 %v405_v21  ;;  %280 = vmatmul.mubr.bf16.gmra.mrb[8].mxu1 %v406_v22 }
  0x33   :  { %249 = vmatprep.mubr.bf16.mxu0 %v409_v1  ;;  %289 = vmatprep.mubr.bf16.mxu1 %v409_v1 }
  0x3a   :  { %250 = vmatmul.mubr.bf16.gmra.mrb[12].mxu0 %v407_v23  ;;  %290 = vmatmul.mubr.bf16.gmra.mrb[12].mxu1 %v408_v24 }
  0xf5   :  { %v221_v32 = vpop.f32.mrb[0].mxu0  ;;  %v261_v33 = vpop.f32.mrb[0].mxu1 }
  0xf6   :  { %v222_v34 = vadd.f32 %v221_v32, %v513_v30  ;;  %v262_v35 = vadd.f32 %v261_v33, %v513_v30  ;;  %v223_v36 = vpop.f32.mrb[1].mxu0  ;;  %v263_v37 = vpop.f32.mrb[1].mxu1 }
  0xf7   :  { %v224_v38 = vadd.f32 %v223_v36, %v515_v31  ;;  %v264_v39 = vadd.f32 %v263_v37, %v515_v31  ;;  %v225_v40 = vpop.f32.mrb[2].mxu0  ;;  %v265_v41 = vpop.f32.mrb[2].mxu1 }
  0xf8   :  { %300 = vst [vmem:[%s648_s3] sm:$0xff] %v222_v34  ;;  %316 = vst [vmem:[%s648_s3 + $0x80] sm:$0xff] %v262_v35  ;;  %v226_v42 = vadd.f32 %v225_v40, %v513_v30  ;;  %v266_v43 = vadd.f32 %v265_v41, %v513_v30  ;;  %v227_v44 = vpop.f32.mrb[3].mxu0  ;;  %v267_v45 = vpop.f32.mrb[3].mxu1 }
  0xf9   :  { %301 = vst [vmem:[%s648_s3 + $0x8] sm:$0xff] %v224_v38  ;;  %317 = vst [vmem:[%s648_s3 + $0x88] sm:$0xff] %v264_v39  ;;  %v228_v46 = vadd.f32 %v227_v44, %v515_v31  ;;  %v268_v47 = vadd.f32 %v267_v45, %v515_v31 }
  0xfa   :  { %302 = vst [vmem:[%s648_s3 + $0x10] sm:$0xff] %v226_v42  ;;  %318 = vst [vmem:[%s648_s3 + $0x90] sm:$0xff] %v266_v43 }
  0xfb   :  { %303 = vst [vmem:[%s648_s3 + $0x18] sm:$0xff] %v228_v46  ;;  %319 = vst [vmem:[%s648_s3 + $0x98] sm:$0xff] %v268_v47 }
  0xfd   :  { %v231_v48 = vpop.f32.mrb[4].mxu0  ;;  %v271_v49 = vpop.f32.mrb[4].mxu1 }
  0xfe   :  { %v232_v50 = vadd.f32 %v231_v48, %v513_v30  ;;  %v272_v51 = vadd.f32 %v271_v49, %v513_v30  ;;  %v233_v52 = vpop.f32.mrb[5].mxu0  ;;  %v273_v53 = vpop.f32.mrb[5].mxu1 }
  0xff   :  { %v234_v54 = vadd.f32 %v233_v52, %v515_v31  ;;  %v274_v55 = vadd.f32 %v273_v53, %v515_v31  ;;  %v235_v56 = vpop.f32.mrb[6].mxu0  ;;  %v275_v57 = vpop.f32.mrb[6].mxu1 }
 0x100   :  { %304 = vst [vmem:[%s648_s3 + $0x20] sm:$0xff] %v232_v50  ;;  %320 = vst [vmem:[%s648_s3 + $0xa0] sm:$0xff] %v272_v51  ;;  %v236_v58 = vadd.f32 %v235_v56, %v513_v30  ;;  %v276_v59 = vadd.f32 %v275_v57, %v513_v30  ;;  %v237_v60 = vpop.f32.mrb[7].mxu0  ;;  %v277_v61 = vpop.f32.mrb[7].mxu1 }
 0x101   :  { %305 = vst [vmem:[%s648_s3 + $0x28] sm:$0xff] %v234_v54  ;;  %321 = vst [vmem:[%s648_s3 + $0xa8] sm:$0xff] %v274_v55  ;;  %v238_v62 = vadd.f32 %v237_v60, %v515_v31  ;;  %v278_v63 = vadd.f32 %v277_v61, %v515_v31 }
 0x102   :  { %306 = vst [vmem:[%s648_s3 + $0x30] sm:$0xff] %v236_v58  ;;  %322 = vst [vmem:[%s648_s3 + $0xb0] sm:$0xff] %v276_v59 }
 0x103   :  { %307 = vst [vmem:[%s648_s3 + $0x38] sm:$0xff] %v238_v62  ;;  %323 = vst [vmem:[%s648_s3 + $0xb8] sm:$0xff] %v278_v63 }
 0x105   :  { %v241_v0 = vpop.f32.mrb[8].mxu0  ;;  %v281_v1 = vpop.f32.mrb[8].mxu1 }
 0x106   :  { %v242_v2 = vadd.f32 %v241_v0, %v513_v30  ;;  %v282_v3 = vadd.f32 %v281_v1, %v513_v30  ;;  %v243_v4 = vpop.f32.mrb[9].mxu0  ;;  %v283_v5 = vpop.f32.mrb[9].mxu1 }
 0x107   :  { %v244_v6 = vadd.f32 %v243_v4, %v515_v31  ;;  %v284_v7 = vadd.f32 %v283_v5, %v515_v31  ;;  %v245_v8 = vpop.f32.mrb[10].mxu0  ;;  %v285_v9 = vpop.f32.mrb[10].mxu1 }
 0x108   :  { %308 = vst [vmem:[%s648_s3 + $0x40] sm:$0xff] %v242_v2  ;;  %324 = vst [vmem:[%s648_s3 + $0xc0] sm:$0xff] %v282_v3  ;;  %v246_v10 = vadd.f32 %v245_v8, %v513_v30  ;;  %v286_v11 = vadd.f32 %v285_v9, %v513_v30  ;;  %v247_v12 = vpop.f32.mrb[11].mxu0  ;;  %v287_v13 = vpop.f32.mrb[11].mxu1 }
 0x109   :  { %309 = vst [vmem:[%s648_s3 + $0x48] sm:$0xff] %v244_v6  ;;  %325 = vst [vmem:[%s648_s3 + $0xc8] sm:$0xff] %v284_v7  ;;  %v248_v14 = vadd.f32 %v247_v12, %v515_v31  ;;  %v288_v15 = vadd.f32 %v287_v13, %v515_v31 }
 0x10a   :  { %310 = vst [vmem:[%s648_s3 + $0x50] sm:$0xff] %v246_v10  ;;  %326 = vst [vmem:[%s648_s3 + $0xd0] sm:$0xff] %v286_v11 }
 0x10b   :  { %311 = vst [vmem:[%s648_s3 + $0x58] sm:$0xff] %v248_v14  ;;  %327 = vst [vmem:[%s648_s3 + $0xd8] sm:$0xff] %v288_v15 }
 0x10d   :  { %v251_v16 = vpop.f32.mrb[12].mxu0  ;;  %v291_v17 = vpop.f32.mrb[12].mxu1 }
 0x10e   :  { %v252_v18 = vadd.f32 %v251_v16, %v513_v30  ;;  %v292_v19 = vadd.f32 %v291_v17, %v513_v30  ;;  %v253_v20 = vpop.f32.mrb[13].mxu0  ;;  %v293_v21 = vpop.f32.mrb[13].mxu1 }
 0x10f   :  { %v254_v22 = vadd.f32 %v253_v20, %v515_v31  ;;  %v294_v23 = vadd.f32 %v293_v21, %v515_v31  ;;  %v255_v24 = vpop.f32.mrb[14].mxu0  ;;  %v295_v25 = vpop.f32.mrb[14].mxu1 }
 0x110   :  { %312 = vst [vmem:[%s648_s3 + $0x60] sm:$0xff] %v252_v18  ;;  %328 = vst [vmem:[%s648_s3 + $0xe0] sm:$0xff] %v292_v19  ;;  %v256_v26 = vadd.f32 %v255_v24, %v513_v30  ;;  %v296_v27 = vadd.f32 %v295_v25, %v513_v30  ;;  %v257_v28 = vpop.f32.mrb[15].mxu0  ;;  %v297_v29 = vpop.f32.mrb[15].mxu1 }
 0x111   :  { %313 = vst [vmem:[%s648_s3 + $0x68] sm:$0xff] %v254_v22  ;;  %329 = vst [vmem:[%s648_s3 + $0xe8] sm:$0xff] %v294_v23  ;;  %v258_v32 = vadd.f32 %v257_v28, %v515_v31  ;;  %v298_v33 = vadd.f32 %v297_v29, %v515_v31 }
 0x112   :  { %314 = vst [vmem:[%s648_s3 + $0x70] sm:$0xff] %v256_v26  ;;  %330 = vst [vmem:[%s648_s3 + $0xf0] sm:$0xff] %v296_v27 }
 0x113   :  { %315 = vst [vmem:[%s648_s3 + $0x78] sm:$0xff] %v258_v32  ;;  %331 = vst [vmem:[%s648_s3 + $0xf8] sm:$0xff] %v298_v33 }

</bundles_post_ra>
